<compile_context>
chip_gen: v7x
topology: tpu7x:2x2x1
jax: 0.10.0
libtpu: 0.0.40
codegen_flags: <defaults>
</compile_context>

<pallas_src>
import math
import functools

import numpy as np
import jax
import jax.numpy as jnp
from jax import lax
from jax.experimental import pallas as pl
from jax.experimental.pallas import tpu as pltpu

EPS = 1e-6  # Norm eps (matches the reference Norm module)


def _encoder_kernel(
    x0_ref, mask_ref,
    n1a_ref, n1b_ref,
    wq_ref, bq_ref, wk_ref, bk_ref, wv_ref, bv_ref, wo_ref, bo_ref,
    n2a_ref, n2b_ref,
    w1_ref, b1_ref, w2_ref, b2_ref,
    nfa_ref, nfb_ref,
    out_ref, att_ref,
    x_vmem,
    *, heads):
  l = pl.program_id(1)
  BB, S, D = x_vmem.shape
  H = heads
  dk = D // H
  F = w1_ref.shape[-1]

  @pl.when(l == 0)
  def _():
    # x0 already has positional encoding applied in the wrapper.
    x_vmem[...] = x0_ref[...]

  def layer_norm(v, alpha, bias):
    # reference Norm: alpha * (x - mean) / (std + eps) + bias, torch.std ddof=1
    mean = jnp.mean(v, axis=-1, keepdims=True)
    var = jnp.sum((v - mean) ** 2, axis=-1, keepdims=True) * (1.0 / (D - 1))
    return alpha * (v - mean) / (jnp.sqrt(var) + EPS) + bias

  x = x_vmem[...]                                    # (BB, S, D)

  # ------------- self-attention sublayer (pre-norm + residual) -------------
  x2 = layer_norm(x, n1a_ref[0], n1b_ref[0])
  x2f = x2.reshape(BB * S, D)

  # Full-width projections: full MXU column fill (scale folded into Wq/bq).
  q = jnp.dot(x2f, wq_ref[0], preferred_element_type=jnp.float32) + bq_ref[0]
  k = jnp.dot(x2f, wk_ref[0], preferred_element_type=jnp.float32) + bk_ref[0]
  v = jnp.dot(x2f, wv_ref[0], preferred_element_type=jnp.float32) + bv_ref[0]
  q = q.reshape(BB, S, D)
  k = k.reshape(BB, S, D)
  v = v.reshape(BB, S, D)

  # Additive mask, computed once per batch block (hoisted out of head loop).
  mask_add = jnp.where(mask_ref[...] == 0.0,
                       jnp.float32(-1e9), jnp.float32(0.0))   # (BB, 1, S)

  # Per-head scores/softmax/ctx, batched over the batch dim via einsum.
  # (The head loop is a short static unroll; the MXU-dominant projection and
  #  output matmuls above/below are full-width.)
  ctx_heads = []
  for h in range(H):
    qh = q[:, :, h * dk:(h + 1) * dk]                          # (BB, S, dk)
    kh = k[:, :, h * dk:(h + 1) * dk]
    vh = v[:, :, h * dk:(h + 1) * dk]
    s = jnp.einsum('bqd,bkd->bqk', qh, kh,
                   preferred_element_type=jnp.float32)         # (BB, S, S)
    s = s + mask_add
    s = s - jnp.max(s, axis=-1, keepdims=True)
    e = jnp.exp(s)
    a = e / jnp.sum(e, axis=-1, keepdims=True)
    att_ref[:, 0, h] = a.astype(att_ref.dtype)                 # (BB, S, S)
    ctx_heads.append(jnp.einsum('bqk,bkd->bqd', a, vh,
                                preferred_element_type=jnp.float32))
  # Assemble all heads and run Wo as one full-K (D) matmul.
  ctx = jnp.concatenate(ctx_heads, axis=-1).reshape(BB * S, D)
  attn_out = jnp.dot(ctx, wo_ref[0],
                     preferred_element_type=jnp.float32) + bo_ref[0]
  # dropout_1 identity in eval
  x = x + attn_out.reshape(BB, S, D)
  x_vmem[...] = x

  # ------------- feed-forward sublayer (pre-norm + residual) ---------------
  # Chunk the rows along S so the (rows, F) f32 hidden activation stays
  # bounded in VMEM; each chunk is still wide enough to fill the MXU.
  ff_budget_elems = (8 * 1024 * 1024) // 4
  s_chunk = S
  while s_chunk > 8 and BB * s_chunk * F > ff_budget_elems and s_chunk % 2 == 0:
    s_chunk //= 2
  for c in range(S // s_chunk):
    s0 = c * s_chunk
    xc = x[:, s0:s0 + s_chunk]                                  # (BB, sc, D)
    x2c = layer_norm(xc, n2a_ref[0], n2b_ref[0]).reshape(BB * s_chunk, D)
    hid = jnp.maximum(
        jnp.dot(x2c, w1_ref[0], preferred_element_type=jnp.float32)
        + b1_ref[0], 0.0)
    ff = jnp.dot(hid, w2_ref[0], preferred_element_type=jnp.float32) + b2_ref[0]
    # dropout_2 identity in eval
    x_vmem[:, s0:s0 + s_chunk] = xc + ff.reshape(BB, s_chunk, D)

  @pl.when(l == pl.num_programs(1) - 1)
  def _():
    # Encoder's trailing Norm
    out_ref[...] = layer_norm(x_vmem[...], nfa_ref[...], nfb_ref[...])


def _make_pe_table(max_len, d_model):
  pe = np.zeros((max_len, d_model), dtype=np.float32)
  for pos in range(max_len):
    for i in range(0, d_model, 2):
      pe[pos, i] = math.sin(pos / (10000 ** ((2 * i) / d_model)))
      if i + 1 < d_model:
        pe[pos, i + 1] = math.cos(pos / (10000 ** ((2 * (i + 1)) / d_model)))
  return jnp.asarray(pe)


def init_encoder_params(key, n_layers, d_model, d_ff):
  ks = jax.random.split(key, 8)
  N, D, F = n_layers, d_model, d_ff

  def w(k, shape, scale=0.08):
    return (scale * jax.random.normal(k, shape)).astype(jnp.float32)

  return dict(
      n1a=jnp.ones((N, 1, D), jnp.float32), n1b=jnp.zeros((N, 1, D), jnp.float32),
      wq=w(ks[0], (N, D, D)), bq=jnp.zeros((N, 1, D), jnp.float32),
      wk=w(ks[1], (N, D, D)), bk=jnp.zeros((N, 1, D), jnp.float32),
      wv=w(ks[2], (N, D, D)), bv=jnp.zeros((N, 1, D), jnp.float32),
      wo=w(ks[3], (N, D, D)), bo=jnp.zeros((N, 1, D), jnp.float32),
      n2a=jnp.ones((N, 1, D), jnp.float32), n2b=jnp.zeros((N, 1, D), jnp.float32),
      w1=w(ks[4], (N, D, F)), b1=w(ks[5], (N, 1, F), 0.02),
      w2=w(ks[6], (N, F, D)), b2=w(ks[7], (N, 1, D), 0.02),
      nfa=jnp.ones((1, D), jnp.float32), nfb=jnp.zeros((1, D), jnp.float32),
  )


def encoder_forward(src, mask, params, *, heads, n_layers, max_frames,
                    is_test=True, batch_block=None, att_dtype=jnp.bfloat16):
  del is_test  # dropout is identity either way in this kernel (eval path)
  B, S, D = src.shape
  F = params["w1"].shape[-1]
  assert D % heads == 0
  dk = D // heads

  # Keep the "parallel" batch axis extent >= 2 so v7x's second TensorCore
  # gets work; on v5e/v6e the extra per-block weight re-fetch is negligible.
  if batch_block is None:
    batch_block = B // 2 if (B >= 2 and B % 2 == 0) else B
  assert B % batch_block == 0
  BB = batch_block
  nb = B // BB

  # Positional encoding hoisted into the wrapper (plain XLA elementwise).
  pe = _make_pe_table(max_frames, D)[:S]
  x0 = src.astype(jnp.float32) * jnp.float32(math.sqrt(D)) + pe[None, :, :]

  # Fold the 1/sqrt(dk) attention scale into the Q projection.
  scale = jnp.float32(1.0 / math.sqrt(dk))
  wq = params["wq"] * scale
  bq = params["bq"] * scale

  bmap = lambda b, l: (b, 0, 0)
  lmap3 = lambda b, l: (l, 0, 0)
  fmap = lambda b, l: (0, 0)

  in_specs = [
      pl.BlockSpec((BB, S, D), bmap),     # x0 (PE already applied)
      pl.BlockSpec((BB, 1, S), bmap),     # mask
      pl.BlockSpec((1, 1, D), lmap3),     # norm1 alpha
      pl.BlockSpec((1, 1, D), lmap3),     # norm1 bias
      pl.BlockSpec((1, D, D), lmap3),     # Wq (pre-scaled)
      pl.BlockSpec((1, 1, D), lmap3),     # bq (pre-scaled)
      pl.BlockSpec((1, D, D), lmap3),     # Wk
      pl.BlockSpec((1, 1, D), lmap3),     # bk
      pl.BlockSpec((1, D, D), lmap3),     # Wv
      pl.BlockSpec((1, 1, D), lmap3),     # bv
      pl.BlockSpec((1, D, D), lmap3),     # Wo
      pl.BlockSpec((1, 1, D), lmap3),     # bo
      pl.BlockSpec((1, 1, D), lmap3),     # norm2 alpha
      pl.BlockSpec((1, 1, D), lmap3),     # norm2 bias
      pl.BlockSpec((1, D, F), lmap3),     # ff W1
      pl.BlockSpec((1, 1, F), lmap3),     # ff b1
      pl.BlockSpec((1, F, D), lmap3),     # ff W2
      pl.BlockSpec((1, 1, D), lmap3),     # ff b2
      pl.BlockSpec((1, D), fmap),         # final norm alpha
      pl.BlockSpec((1, D), fmap),         # final norm bias
  ]
  out_specs = (
      pl.BlockSpec((BB, S, D), bmap),                                      # out
      pl.BlockSpec((BB, 1, heads, S, S), lambda b, l: (b, l, 0, 0, 0)),    # att
  )
  out_shape = (
      jax.ShapeDtypeStruct((B, S, D), jnp.float32),
      jax.ShapeDtypeStruct((B, n_layers, heads, S, S), att_dtype),
  )

  # Generation-aware VMEM limit: headroom below 64 MiB on v7x, ~100 MiB on
  # v5e/v6e (128 MiB physical).
  try:
    vmem_cap = getattr(pltpu.get_tpu_info(), "vmem_capacity_bytes",
                       128 * 1024 * 1024)
  except Exception:
    vmem_cap = 128 * 1024 * 1024
  vmem_limit = max(32 * 1024 * 1024,
                   min(vmem_cap - 16 * 1024 * 1024, 100 * 1024 * 1024))

  kernel = functools.partial(_encoder_kernel, heads=heads)
  out, att = pl.pallas_call(
      kernel,
      out_shape=out_shape,
      grid_spec=pltpu.PrefetchScalarGridSpec(
          num_scalar_prefetch=0,
          grid=(nb, n_layers),               # layer axis innermost (x carry)
          in_specs=in_specs,
          out_specs=out_specs,
          scratch_shapes=[pltpu.VMEM((BB, S, D), jnp.float32)],  # running x
      ),
      compiler_params=pltpu.CompilerParams(
          dimension_semantics=("parallel", "arbitrary"),
          vmem_limit_bytes=vmem_limit),
      # x0 is only read at l == 0, out only written at the last layer: share
      # one HBM buffer.
      input_output_aliases={0: 0},
  )(x0, mask.astype(jnp.float32),
    params["n1a"], params["n1b"],
    wq, bq, params["wk"], params["bk"], params["wv"], params["bv"],
    params["wo"], params["bo"],
    params["n2a"], params["n2b"],
    params["w1"], params["b1"], params["w2"], params["b2"],
    params["nfa"], params["nfb"])

  att_dict = {f"layer{i}": att[:, i] for i in range(n_layers)}
  return out, att_dict


if __name__ == "__main__":
  B, S, D, H, N_LAYERS, D_FF, MAX_FRAMES = 2, 8, 32, 4, 2, 64, 16

  key = jax.random.PRNGKey(0)
  k_src, k_par = jax.random.split(key)
  src = jax.random.normal(k_src, (B, S, D), dtype=jnp.float32)
  mask = jnp.ones((B, 1, S), dtype=jnp.float32)
  mask = mask.at[1, 0, S - 1].set(0.0)  # mask the last key position of batch 1

  params = init_encoder_params(k_par, N_LAYERS, D, D_FF)

  out, att = encoder_forward(src, mask, params, heads=H, n_layers=N_LAYERS,
                             max_frames=MAX_FRAMES, is_test=True)
  jax.block_until_ready((out, att))

  assert out.shape == (B, S, D)
  assert att["layer0"].shape == (B, H, S, S)
  assert att["layer1"].shape == (B, H, S, S)
  assert bool(jnp.all(jnp.isfinite(out)))
  print("KERNEL_OK")
</pallas_src>

<mosaic_0001>
module attributes {stable_mosaic.version = 11 : i64} {
  func.func @_encoder_kernel(%arg0: i32, %arg1: i32, %arg2: memref<1x8x32xf32, #tpu.memory_space<vmem>>, %arg3: memref<1x1x8xf32, #tpu.memory_space<vmem>>, %arg4: memref<1x1x32xf32, #tpu.memory_space<vmem>>, %arg5: memref<1x1x32xf32, #tpu.memory_space<vmem>>, %arg6: memref<1x32x32xf32, #tpu.memory_space<vmem>>, %arg7: memref<1x1x32xf32, #tpu.memory_space<vmem>>, %arg8: memref<1x32x32xf32, #tpu.memory_space<vmem>>, %arg9: memref<1x1x32xf32, #tpu.memory_space<vmem>>, %arg10: memref<1x32x32xf32, #tpu.memory_space<vmem>>, %arg11: memref<1x1x32xf32, #tpu.memory_space<vmem>>, %arg12: memref<1x32x32xf32, #tpu.memory_space<vmem>>, %arg13: memref<1x1x32xf32, #tpu.memory_space<vmem>>, %arg14: memref<1x1x32xf32, #tpu.memory_space<vmem>>, %arg15: memref<1x1x32xf32, #tpu.memory_space<vmem>>, %arg16: memref<1x32x64xf32, #tpu.memory_space<vmem>>, %arg17: memref<1x1x64xf32, #tpu.memory_space<vmem>>, %arg18: memref<1x64x32xf32, #tpu.memory_space<vmem>>, %arg19: memref<1x1x32xf32, #tpu.memory_space<vmem>>, %arg20: memref<1x32xf32, #tpu.memory_space<vmem>>, %arg21: memref<1x32xf32, #tpu.memory_space<vmem>>, %arg22: memref<1x8x32xf32, #tpu.memory_space<vmem>>, %arg23: memref<1x1x4x8x8xbf16, #tpu.memory_space<vmem>>, %arg24: memref<1x8x32xf32, #tpu.memory_space<vmem>>) attributes {dimension_semantics = [#tpu.dimension_semantics<parallel>, #tpu.dimension_semantics<arbitrary>], iteration_bounds = array<i64: 2, 2>, scalar_prefetch = 0 : i64, scratch_operands = 1 : i64, tpu.core_type = #tpu.core_type<tc>, window_params = [{transform_indices = @transform_0, window_bounds = array<i64: 1, 8, 32>}, {transform_indices = @transform_1, window_bounds = array<i64: 1, 1, 8>}, {transform_indices = @transform_2, window_bounds = array<i64: 1, 1, 32>}, {transform_indices = @transform_3, window_bounds = array<i64: 1, 1, 32>}, {transform_indices = @transform_4, window_bounds = array<i64: 1, 32, 32>}, {transform_indices = @transform_5, window_bounds = array<i64: 1, 1, 32>}, {transform_indices = @transform_6, window_bounds = array<i64: 1, 32, 32>}, {transform_indices = @transform_7, window_bounds = array<i64: 1, 1, 32>}, {transform_indices = @transform_8, window_bounds = array<i64: 1, 32, 32>}, {transform_indices = @transform_9, window_bounds = array<i64: 1, 1, 32>}, {transform_indices = @transform_10, window_bounds = array<i64: 1, 32, 32>}, {transform_indices = @transform_11, window_bounds = array<i64: 1, 1, 32>}, {transform_indices = @transform_12, window_bounds = array<i64: 1, 1, 32>}, {transform_indices = @transform_13, window_bounds = array<i64: 1, 1, 32>}, {transform_indices = @transform_14, window_bounds = array<i64: 1, 32, 64>}, {transform_indices = @transform_15, window_bounds = array<i64: 1, 1, 64>}, {transform_indices = @transform_16, window_bounds = array<i64: 1, 64, 32>}, {transform_indices = @transform_17, window_bounds = array<i64: 1, 1, 32>}, {pipeline_mode = #tpu.pipeline_mode<synchronous>, transform_indices = @transform_18, window_bounds = array<i64: 1, 32>}, {pipeline_mode = #tpu.pipeline_mode<synchronous>, transform_indices = @transform_19, window_bounds = array<i64: 1, 32>}, {transform_indices = @transform_20, window_bounds = array<i64: 1, 8, 32>}, {transform_indices = @transform_21, window_bounds = array<i64: 1, 1, 4, 8, 8>}]} {
    %c0_i32 = arith.constant 0 : i32
    %0 = arith.cmpi eq, %arg1, %c0_i32 : i32
    %1 = arith.extui %0 : i1 to i32
    %c0_i32_0 = arith.constant 0 : i32
    %2 = arith.cmpi ne, %1, %c0_i32_0 : i32
    scf.if %2 {
      %c0_113 = arith.constant 0 : index
      %c0_114 = arith.constant 0 : index
      %c0_115 = arith.constant 0 : index
      %206 = vector.load %arg2[%c0_113, %c0_114, %c0_115] : memref<1x8x32xf32, #tpu.memory_space<vmem>>, vector<1x8x32xf32>
      %c0_116 = arith.constant 0 : index
      %c0_117 = arith.constant 0 : index
      %c0_118 = arith.constant 0 : index
      %207 = vector.load %arg24[%c0_116, %c0_117, %c0_118] : memref<1x8x32xf32, #tpu.memory_space<vmem>>, vector<1x8x32xf32>
      tpu.vector_store %arg24[%c0_116, %c0_117, %c0_118], %206 {strides = array<i32>} : memref<1x8x32xf32, #tpu.memory_space<vmem>>, vector<1x8x32xf32>,
    } else {
    }
    %c0 = arith.constant 0 : index
    %c0_1 = arith.constant 0 : index
    %c0_2 = arith.constant 0 : index
    %3 = vector.load %arg24[%c0, %c0_1, %c0_2] : memref<1x8x32xf32, #tpu.memory_space<vmem>>, vector<1x8x32xf32>
    %c0_3 = arith.constant 0 : index
    %c0_4 = arith.constant 0 : index
    %c0_5 = arith.constant 0 : index
    %4 = vector.load %arg4[%c0_3, %c0_4, %c0_5] : memref<1x1x32xf32, #tpu.memory_space<vmem>>, vector<1x1x32xf32>
    %5 = vector.shape_cast %4 : vector<1x1x32xf32> to vector<1x32xf32>
    %c0_6 = arith.constant 0 : index
    %c0_7 = arith.constant 0 : index
    %c0_8 = arith.constant 0 : index
    %6 = vector.load %arg5[%c0_6, %c0_7, %c0_8] : memref<1x1x32xf32, #tpu.memory_space<vmem>>, vector<1x1x32xf32>
    %7 = vector.shape_cast %6 : vector<1x1x32xf32> to vector<1x32xf32>
    %cst = arith.constant dense<0.000000e+00> : vector<1x8xf32>
    %8 = vector.multi_reduction <add>, %3, %cst [2] : vector<1x8x32xf32> to vector<1x8xf32>
    %9 = vector.shape_cast %8 : vector<1x8xf32> to vector<1x8x1xf32>
    %cst_9 = arith.constant 3.200000e+01 : f32
    %10 = vector.broadcast %cst_9 : f32 to vector<1x8x1xf32>
    %11 = arith.divf %9, %10 : vector<1x8x1xf32>
    %12 = vector.broadcast %11 : vector<1x8x1xf32> to vector<1x8x32xf32>
    %13 = arith.subf %3, %12 : vector<1x8x32xf32>
    %14 = arith.mulf %13, %13 : vector<1x8x32xf32>
    %cst_10 = arith.constant dense<0.000000e+00> : vector<1x8xf32>
    %15 = vector.multi_reduction <add>, %14, %cst_10 [2] : vector<1x8x32xf32> to vector<1x8xf32>
    %16 = vector.shape_cast %15 : vector<1x8xf32> to vector<1x8x1xf32>
    %cst_11 = arith.constant 0.0322580636 : f32
    %17 = vector.broadcast %cst_11 : f32 to vector<1x8x1xf32>
    %18 = arith.mulf %16, %17 : vector<1x8x1xf32>
    %19 = vector.broadcast %11 : vector<1x8x1xf32> to vector<1x8x32xf32>
    %20 = arith.subf %3, %19 : vector<1x8x32xf32>
    %21 = vector.shape_cast %5 : vector<1x32xf32> to vector<1x1x32xf32>
    %22 = vector.broadcast %21 : vector<1x1x32xf32> to vector<1x8x32xf32>
    %23 = arith.mulf %22, %20 : vector<1x8x32xf32>
    %24 = math.sqrt %18 : vector<1x8x1xf32>
    %cst_12 = arith.constant 9.99999997E-7 : f32
    %25 = vector.broadcast %cst_12 : f32 to vector<1x8x1xf32>
    %26 = arith.addf %24, %25 : vector<1x8x1xf32>
    %27 = vector.broadcast %26 : vector<1x8x1xf32> to vector<1x8x32xf32>
    %28 = arith.divf %23, %27 : vector<1x8x32xf32>
    %29 = vector.shape_cast %7 : vector<1x32xf32> to vector<1x1x32xf32>
    %30 = vector.broadcast %29 : vector<1x1x32xf32> to vector<1x8x32xf32>
    %31 = arith.addf %28, %30 : vector<1x8x32xf32>
    %32 = vector.shape_cast %31 : vector<1x8x32xf32> to vector<8x32xf32>
    %c0_13 = arith.constant 0 : index
    %c0_14 = arith.constant 0 : index
    %c0_15 = arith.constant 0 : index
    %33 = vector.load %arg6[%c0_13, %c0_14, %c0_15] : memref<1x32x32xf32, #tpu.memory_space<vmem>>, vector<1x32x32xf32>
    %34 = vector.shape_cast %33 : vector<1x32x32xf32> to vector<32x32xf32>
    %cst_16 = arith.constant dense<0.000000e+00> : vector<8x32xf32>
    %35 = tpu.matmul %32, %34, %cst_16 {dimension_numbers = #tpu.dot_dimension_numbers<[1], [0], [0], [1], [0, 0, 1, 1], [], []>} : vector<8x32xf32>, vector<32x32xf32>, vector<8x32xf32> -> vector<8x32xf32>
    %c0_17 = arith.constant 0 : index
    %c0_18 = arith.constant 0 : index
    %c0_19 = arith.constant 0 : index
    %36 = vector.load %arg7[%c0_17, %c0_18, %c0_19] : memref<1x1x32xf32, #tpu.memory_space<vmem>>, vector<1x1x32xf32>
    %37 = vector.shape_cast %36 : vector<1x1x32xf32> to vector<1x32xf32>
    %38 = vector.broadcast %37 : vector<1x32xf32> to vector<8x32xf32>
    %39 = arith.addf %35, %38 : vector<8x32xf32>
    %c0_20 = arith.constant 0 : index
    %c0_21 = arith.constant 0 : index
    %c0_22 = arith.constant 0 : index
    %40 = vector.load %arg8[%c0_20, %c0_21, %c0_22] : memref<1x32x32xf32, #tpu.memory_space<vmem>>, vector<1x32x32xf32>
    %41 = vector.shape_cast %40 : vector<1x32x32xf32> to vector<32x32xf32>
    %cst_23 = arith.constant dense<0.000000e+00> : vector<8x32xf32>
    %42 = tpu.matmul %32, %41, %cst_23 {dimension_numbers = #tpu.dot_dimension_numbers<[1], [0], [0], [1], [0, 0, 1, 1], [], []>} : vector<8x32xf32>, vector<32x32xf32>, vector<8x32xf32> -> vector<8x32xf32>
    %c0_24 = arith.constant 0 : index
    %c0_25 = arith.constant 0 : index
    %c0_26 = arith.constant 0 : index
    %43 = vector.load %arg9[%c0_24, %c0_25, %c0_26] : memref<1x1x32xf32, #tpu.memory_space<vmem>>, vector<1x1x32xf32>
    %44 = vector.shape_cast %43 : vector<1x1x32xf32> to vector<1x32xf32>
    %45 = vector.broadcast %44 : vector<1x32xf32> to vector<8x32xf32>
    %46 = arith.addf %42, %45 : vector<8x32xf32>
    %c0_27 = arith.constant 0 : index
    %c0_28 = arith.constant 0 : index
    %c0_29 = arith.constant 0 : index
    %47 = vector.load %arg10[%c0_27, %c0_28, %c0_29] : memref<1x32x32xf32, #tpu.memory_space<vmem>>, vector<1x32x32xf32>
    %48 = vector.shape_cast %47 : vector<1x32x32xf32> to vector<32x32xf32>
    %cst_30 = arith.constant dense<0.000000e+00> : vector<8x32xf32>
    %49 = tpu.matmul %32, %48, %cst_30 {dimension_numbers = #tpu.dot_dimension_numbers<[1], [0], [0], [1], [0, 0, 1, 1], [], []>} : vector<8x32xf32>, vector<32x32xf32>, vector<8x32xf32> -> vector<8x32xf32>
    %c0_31 = arith.constant 0 : index
    %c0_32 = arith.constant 0 : index
    %c0_33 = arith.constant 0 : index
    %50 = vector.load %arg11[%c0_31, %c0_32, %c0_33] : memref<1x1x32xf32, #tpu.memory_space<vmem>>, vector<1x1x32xf32>
    %51 = vector.shape_cast %50 : vector<1x1x32xf32> to vector<1x32xf32>
    %52 = vector.broadcast %51 : vector<1x32xf32> to vector<8x32xf32>
    %53 = arith.addf %49, %52 : vector<8x32xf32>
    %54 = vector.shape_cast %39 : vector<8x32xf32> to vector<1x8x32xf32>
    %55 = vector.shape_cast %46 : vector<8x32xf32> to vector<1x8x32xf32>
    %56 = vector.shape_cast %53 : vector<8x32xf32> to vector<1x8x32xf32>
    %c0_34 = arith.constant 0 : index
    %c0_35 = arith.constant 0 : index
    %c0_36 = arith.constant 0 : index
    %57 = vector.load %arg3[%c0_34, %c0_35, %c0_36] : memref<1x1x8xf32, #tpu.memory_space<vmem>>, vector<1x1x8xf32>
    %cst_37 = arith.constant 0.000000e+00 : f32
    %58 = vector.broadcast %cst_37 : f32 to vector<1x1x8xf32>
    %59 = arith.cmpf oeq, %57, %58 : vector<1x1x8xf32>
    %cst_38 = arith.constant -1.000000e+09 : f32
    %cst_39 = arith.constant 0.000000e+00 : f32
    %60 = vector.broadcast %cst_38 : f32 to vector<1x1x8xf32>
    %61 = vector.broadcast %cst_39 : f32 to vector<1x1x8xf32>
    %62 = arith.select %59, %60, %61 : vector<1x1x8xi1>, vector<1x1x8xf32>
    %63 = vector.extract_strided_slice %54 {offsets = [0, 0, 0], sizes = [1, 8, 8], strides = [1, 1, 1]} : vector<1x8x32xf32> to vector<1x8x8xf32>
    %64 = vector.extract_strided_slice %55 {offsets = [0, 0, 0], sizes = [1, 8, 8], strides = [1, 1, 1]} : vector<1x8x32xf32> to vector<1x8x8xf32>
    %65 = vector.extract_strided_slice %56 {offsets = [0, 0, 0], sizes = [1, 8, 8], strides = [1, 1, 1]} : vector<1x8x32xf32> to vector<1x8x8xf32>
    "tpu.trace_start"() <{level = 10 : i32, message = "bqd,bkd->bqk"}> : () -> ()
    %cst_40 = arith.constant dense<0.000000e+00> : vector<1x8x8xf32>
    %66 = tpu.matmul %63, %64, %cst_40 {dimension_numbers = #tpu.dot_dimension_numbers<[2], [2], [1], [1], [0, 0, 0, 1, 1, 1], [0], [0]>} : vector<1x8x8xf32>, vector<1x8x8xf32>, vector<1x8x8xf32> -> vector<1x8x8xf32>
    "tpu.trace_stop"() : () -> ()
    %67 = vector.broadcast %62 : vector<1x1x8xf32> to vector<1x8x8xf32>
    %68 = arith.addf %66, %67 : vector<1x8x8xf32>
    %cst_41 = arith.constant dense<0xFF800000> : vector<1x8xf32>
    %69 = vector.multi_reduction <maximumf>, %68, %cst_41 [2] : vector<1x8x8xf32> to vector<1x8xf32>
    %70 = vector.shape_cast %69 : vector<1x8xf32> to vector<1x8x1xf32>
    %71 = vector.broadcast %70 : vector<1x8x1xf32> to vector<1x8x8xf32>
    %72 = arith.subf %68, %71 : vector<1x8x8xf32>
    %73 = math.exp %72 : vector<1x8x8xf32>
    %cst_42 = arith.constant dense<0.000000e+00> : vector<1x8xf32>
    %74 = vector.multi_reduction <add>, %73, %cst_42 [2] : vector<1x8x8xf32> to vector<1x8xf32>
    %75 = vector.shape_cast %74 : vector<1x8xf32> to vector<1x8x1xf32>
    %76 = vector.broadcast %75 : vector<1x8x1xf32> to vector<1x8x8xf32>
    %77 = arith.divf %73, %76 : vector<1x8x8xf32>
    %78 = arith.truncf %77 : vector<1x8x8xf32> to vector<1x8x8xbf16>
    %c0_43 = arith.constant 0 : index
    %c0_44 = arith.constant 0 : index
    %c0_45 = arith.constant 0 : index
    %c0_46 = arith.constant 0 : index
    %c0_47 = arith.constant 0 : index
    %79 = vector.load %arg23[%c0_43, %c0_44, %c0_45, %c0_46, %c0_47] : memref<1x1x4x8x8xbf16, #tpu.memory_space<vmem>>, vector<1x1x1x8x8xbf16>
    %80 = vector.shape_cast %79 : vector<1x1x1x8x8xbf16> to vector<1x8x8xbf16>
    %81 = vector.shape_cast %78 : vector<1x8x8xbf16> to vector<1x1x1x8x8xbf16>
    tpu.vector_store %arg23[%c0_43, %c0_44, %c0_45, %c0_46, %c0_47], %81 {strides = array<i32>} : memref<1x1x4x8x8xbf16, #tpu.memory_space<vmem>>, vector<1x1x1x8x8xbf16>,
    "tpu.trace_start"() <{level = 10 : i32, message = "bqk,bkd->bqd"}> : () -> ()
    %cst_48 = arith.constant dense<0.000000e+00> : vector<1x8x8xf32>
    %82 = tpu.matmul %77, %65, %cst_48 {dimension_numbers = #tpu.dot_dimension_numbers<[2], [1], [1], [2], [0, 0, 0, 1, 1, 2], [0], [0]>} : vector<1x8x8xf32>, vector<1x8x8xf32>, vector<1x8x8xf32> -> vector<1x8x8xf32>
    "tpu.trace_stop"() : () -> ()
    %83 = vector.extract_strided_slice %54 {offsets = [0, 0, 8], sizes = [1, 8, 8], strides = [1, 1, 1]} : vector<1x8x32xf32> to vector<1x8x8xf32>
    %84 = vector.extract_strided_slice %55 {offsets = [0, 0, 8], sizes = [1, 8, 8], strides = [1, 1, 1]} : vector<1x8x32xf32> to vector<1x8x8xf32>
    %85 = vector.extract_strided_slice %56 {offsets = [0, 0, 8], sizes = [1, 8, 8], strides = [1, 1, 1]} : vector<1x8x32xf32> to vector<1x8x8xf32>
    "tpu.trace_start"() <{level = 10 : i32, message = "bqd,bkd->bqk"}> : () -> ()
    %cst_49 = arith.constant dense<0.000000e+00> : vector<1x8x8xf32>
    %86 = tpu.matmul %83, %84, %cst_49 {dimension_numbers = #tpu.dot_dimension_numbers<[2], [2], [1], [1], [0, 0, 0, 1, 1, 1], [0], [0]>} : vector<1x8x8xf32>, vector<1x8x8xf32>, vector<1x8x8xf32> -> vector<1x8x8xf32>
    "tpu.trace_stop"() : () -> ()
    %87 = vector.broadcast %62 : vector<1x1x8xf32> to vector<1x8x8xf32>
    %88 = arith.addf %86, %87 : vector<1x8x8xf32>
    %cst_50 = arith.constant dense<0xFF800000> : vector<1x8xf32>
    %89 = vector.multi_reduction <maximumf>, %88, %cst_50 [2] : vector<1x8x8xf32> to vector<1x8xf32>
    %90 = vector.shape_cast %89 : vector<1x8xf32> to vector<1x8x1xf32>
    %91 = vector.broadcast %90 : vector<1x8x1xf32> to vector<1x8x8xf32>
    %92 = arith.subf %88, %91 : vector<1x8x8xf32>
    %93 = math.exp %92 : vector<1x8x8xf32>
    %cst_51 = arith.constant dense<0.000000e+00> : vector<1x8xf32>
    %94 = vector.multi_reduction <add>, %93, %cst_51 [2] : vector<1x8x8xf32> to vector<1x8xf32>
    %95 = vector.shape_cast %94 : vector<1x8xf32> to vector<1x8x1xf32>
    %96 = vector.broadcast %95 : vector<1x8x1xf32> to vector<1x8x8xf32>
    %97 = arith.divf %93, %96 : vector<1x8x8xf32>
    %98 = arith.truncf %97 : vector<1x8x8xf32> to vector<1x8x8xbf16>
    %c0_52 = arith.constant 0 : index
    %c0_53 = arith.constant 0 : index
    %c1 = arith.constant 1 : index
    %c0_54 = arith.constant 0 : index
    %c0_55 = arith.constant 0 : index
    %99 = vector.load %arg23[%c0_52, %c0_53, %c1, %c0_54, %c0_55] : memref<1x1x4x8x8xbf16, #tpu.memory_space<vmem>>, vector<1x1x1x8x8xbf16>
    %100 = vector.shape_cast %99 : vector<1x1x1x8x8xbf16> to vector<1x8x8xbf16>
    %101 = vector.shape_cast %98 : vector<1x8x8xbf16> to vector<1x1x1x8x8xbf16>
    tpu.vector_store %arg23[%c0_52, %c0_53, %c1, %c0_54, %c0_55], %101 {strides = array<i32>} : memref<1x1x4x8x8xbf16, #tpu.memory_space<vmem>>, vector<1x1x1x8x8xbf16>,
    "tpu.trace_start"() <{level = 10 : i32, message = "bqk,bkd->bqd"}> : () -> ()
    %cst_56 = arith.constant dense<0.000000e+00> : vector<1x8x8xf32>
    %102 = tpu.matmul %97, %85, %cst_56 {dimension_numbers = #tpu.dot_dimension_numbers<[2], [1], [1], [2], [0, 0, 0, 1, 1, 2], [0], [0]>} : vector<1x8x8xf32>, vector<1x8x8xf32>, vector<1x8x8xf32> -> vector<1x8x8xf32>
    "tpu.trace_stop"() : () -> ()
    %103 = vector.extract_strided_slice %54 {offsets = [0, 0, 16], sizes = [1, 8, 8], strides = [1, 1, 1]} : vector<1x8x32xf32> to vector<1x8x8xf32>
    %104 = vector.extract_strided_slice %55 {offsets = [0, 0, 16], sizes = [1, 8, 8], strides = [1, 1, 1]} : vector<1x8x32xf32> to vector<1x8x8xf32>
    %105 = vector.extract_strided_slice %56 {offsets = [0, 0, 16], sizes = [1, 8, 8], strides = [1, 1, 1]} : vector<1x8x32xf32> to vector<1x8x8xf32>
    "tpu.trace_start"() <{level = 10 : i32, message = "bqd,bkd->bqk"}> : () -> ()
    %cst_57 = arith.constant dense<0.000000e+00> : vector<1x8x8xf32>
    %106 = tpu.matmul %103, %104, %cst_57 {dimension_numbers = #tpu.dot_dimension_numbers<[2], [2], [1], [1], [0, 0, 0, 1, 1, 1], [0], [0]>} : vector<1x8x8xf32>, vector<1x8x8xf32>, vector<1x8x8xf32> -> vector<1x8x8xf32>
    "tpu.trace_stop"() : () -> ()
    %107 = vector.broadcast %62 : vector<1x1x8xf32> to vector<1x8x8xf32>
    %108 = arith.addf %106, %107 : vector<1x8x8xf32>
    %cst_58 = arith.constant dense<0xFF800000> : vector<1x8xf32>
    %109 = vector.multi_reduction <maximumf>, %108, %cst_58 [2] : vector<1x8x8xf32> to vector<1x8xf32>
    %110 = vector.shape_cast %109 : vector<1x8xf32> to vector<1x8x1xf32>
    %111 = vector.broadcast %110 : vector<1x8x1xf32> to vector<1x8x8xf32>
    %112 = arith.subf %108, %111 : vector<1x8x8xf32>
    %113 = math.exp %112 : vector<1x8x8xf32>
    %cst_59 = arith.constant dense<0.000000e+00> : vector<1x8xf32>
    %114 = vector.multi_reduction <add>, %113, %cst_59 [2] : vector<1x8x8xf32> to vector<1x8xf32>
    %115 = vector.shape_cast %114 : vector<1x8xf32> to vector<1x8x1xf32>
    %116 = vector.broadcast %115 : vector<1x8x1xf32> to vector<1x8x8xf32>
    %117 = arith.divf %113, %116 : vector<1x8x8xf32>
    %118 = arith.truncf %117 : vector<1x8x8xf32> to vector<1x8x8xbf16>
    %c0_60 = arith.constant 0 : index
    %c0_61 = arith.constant 0 : index
    %c2 = arith.constant 2 : index
    %c0_62 = arith.constant 0 : index
    %c0_63 = arith.constant 0 : index
    %119 = vector.load %arg23[%c0_60, %c0_61, %c2, %c0_62, %c0_63] : memref<1x1x4x8x8xbf16, #tpu.memory_space<vmem>>, vector<1x1x1x8x8xbf16>
    %120 = vector.shape_cast %119 : vector<1x1x1x8x8xbf16> to vector<1x8x8xbf16>
    %121 = vector.shape_cast %118 : vector<1x8x8xbf16> to vector<1x1x1x8x8xbf16>
    tpu.vector_store %arg23[%c0_60, %c0_61, %c2, %c0_62, %c0_63], %121 {strides = array<i32>} : memref<1x1x4x8x8xbf16, #tpu.memory_space<vmem>>, vector<1x1x1x8x8xbf16>,
    "tpu.trace_start"() <{level = 10 : i32, message = "bqk,bkd->bqd"}> : () -> ()
    %cst_64 = arith.constant dense<0.000000e+00> : vector<1x8x8xf32>
    %122 = tpu.matmul %117, %105, %cst_64 {dimension_numbers = #tpu.dot_dimension_numbers<[2], [1], [1], [2], [0, 0, 0, 1, 1, 2], [0], [0]>} : vector<1x8x8xf32>, vector<1x8x8xf32>, vector<1x8x8xf32> -> vector<1x8x8xf32>
    "tpu.trace_stop"() : () -> ()
    %123 = vector.extract_strided_slice %54 {offsets = [0, 0, 24], sizes = [1, 8, 8], strides = [1, 1, 1]} : vector<1x8x32xf32> to vector<1x8x8xf32>
    %124 = vector.extract_strided_slice %55 {offsets = [0, 0, 24], sizes = [1, 8, 8], strides = [1, 1, 1]} : vector<1x8x32xf32> to vector<1x8x8xf32>
    %125 = vector.extract_strided_slice %56 {offsets = [0, 0, 24], sizes = [1, 8, 8], strides = [1, 1, 1]} : vector<1x8x32xf32> to vector<1x8x8xf32>
    "tpu.trace_start"() <{level = 10 : i32, message = "bqd,bkd->bqk"}> : () -> ()
    %cst_65 = arith.constant dense<0.000000e+00> : vector<1x8x8xf32>
    %126 = tpu.matmul %123, %124, %cst_65 {dimension_numbers = #tpu.dot_dimension_numbers<[2], [2], [1], [1], [0, 0, 0, 1, 1, 1], [0], [0]>} : vector<1x8x8xf32>, vector<1x8x8xf32>, vector<1x8x8xf32> -> vector<1x8x8xf32>
    "tpu.trace_stop"() : () -> ()
    %127 = vector.broadcast %62 : vector<1x1x8xf32> to vector<1x8x8xf32>
    %128 = arith.addf %126, %127 : vector<1x8x8xf32>
    %cst_66 = arith.constant dense<0xFF800000> : vector<1x8xf32>
    %129 = vector.multi_reduction <maximumf>, %128, %cst_66 [2] : vector<1x8x8xf32> to vector<1x8xf32>
    %130 = vector.shape_cast %129 : vector<1x8xf32> to vector<1x8x1xf32>
    %131 = vector.broadcast %130 : vector<1x8x1xf32> to vector<1x8x8xf32>
    %132 = arith.subf %128, %131 : vector<1x8x8xf32>
    %133 = math.exp %132 : vector<1x8x8xf32>
    %cst_67 = arith.constant dense<0.000000e+00> : vector<1x8xf32>
    %134 = vector.multi_reduction <add>, %133, %cst_67 [2] : vector<1x8x8xf32> to vector<1x8xf32>
    %135 = vector.shape_cast %134 : vector<1x8xf32> to vector<1x8x1xf32>
    %136 = vector.broadcast %135 : vector<1x8x1xf32> to vector<1x8x8xf32>
    %137 = arith.divf %133, %136 : vector<1x8x8xf32>
    %138 = arith.truncf %137 : vector<1x8x8xf32> to vector<1x8x8xbf16>
    %c0_68 = arith.constant 0 : index
    %c0_69 = arith.constant 0 : index
    %c3 = arith.constant 3 : index
    %c0_70 = arith.constant 0 : index
    %c0_71 = arith.constant 0 : index
    %139 = vector.load %arg23[%c0_68, %c0_69, %c3, %c0_70, %c0_71] : memref<1x1x4x8x8xbf16, #tpu.memory_space<vmem>>, vector<1x1x1x8x8xbf16>
    %140 = vector.shape_cast %139 : vector<1x1x1x8x8xbf16> to vector<1x8x8xbf16>
    %141 = vector.shape_cast %138 : vector<1x8x8xbf16> to vector<1x1x1x8x8xbf16>
    tpu.vector_store %arg23[%c0_68, %c0_69, %c3, %c0_70, %c0_71], %141 {strides = array<i32>} : memref<1x1x4x8x8xbf16, #tpu.memory_space<vmem>>, vector<1x1x1x8x8xbf16>,
    "tpu.trace_start"() <{level = 10 : i32, message = "bqk,bkd->bqd"}> : () -> ()
    %cst_72 = arith.constant dense<0.000000e+00> : vector<1x8x8xf32>
    %142 = tpu.matmul %137, %125, %cst_72 {dimension_numbers = #tpu.dot_dimension_numbers<[2], [1], [1], [2], [0, 0, 0, 1, 1, 2], [0], [0]>} : vector<1x8x8xf32>, vector<1x8x8xf32>, vector<1x8x8xf32> -> vector<1x8x8xf32>
    "tpu.trace_stop"() : () -> ()
    %143 = tpu.concatenate %82, %102, %122, %142 in 2 : vector<1x8x8xf32>, vector<1x8x8xf32>, vector<1x8x8xf32>, vector<1x8x8xf32> -> vector<1x8x32xf32>
    %144 = vector.shape_cast %143 : vector<1x8x32xf32> to vector<8x32xf32>
    %c0_73 = arith.constant 0 : index
    %c0_74 = arith.constant 0 : index
    %c0_75 = arith.constant 0 : index
    %145 = vector.load %arg12[%c0_73, %c0_74, %c0_75] : memref<1x32x32xf32, #tpu.memory_space<vmem>>, vector<1x32x32xf32>
    %146 = vector.shape_cast %145 : vector<1x32x32xf32> to vector<32x32xf32>
    %cst_76 = arith.constant dense<0.000000e+00> : vector<8x32xf32>
    %147 = tpu.matmul %144, %146, %cst_76 {dimension_numbers = #tpu.dot_dimension_numbers<[1], [0], [0], [1], [0, 0, 1, 1], [], []>} : vector<8x32xf32>, vector<32x32xf32>, vector<8x32xf32> -> vector<8x32xf32>
    %c0_77 = arith.constant 0 : index
    %c0_78 = arith.constant 0 : index
    %c0_79 = arith.constant 0 : index
    %148 = vector.load %arg13[%c0_77, %c0_78, %c0_79] : memref<1x1x32xf32, #tpu.memory_space<vmem>>, vector<1x1x32xf32>
    %149 = vector.shape_cast %148 : vector<1x1x32xf32> to vector<1x32xf32>
    %150 = vector.broadcast %149 : vector<1x32xf32> to vector<8x32xf32>
    %151 = arith.addf %147, %150 : vector<8x32xf32>
    %152 = vector.shape_cast %151 : vector<8x32xf32> to vector<1x8x32xf32>
    %153 = arith.addf %3, %152 : vector<1x8x32xf32>
    %c0_80 = arith.constant 0 : index
    %c0_81 = arith.constant 0 : index
    %c0_82 = arith.constant 0 : index
    %154 = vector.load %arg24[%c0_80, %c0_81, %c0_82] : memref<1x8x32xf32, #tpu.memory_space<vmem>>, vector<1x8x32xf32>
    tpu.vector_store %arg24[%c0_80, %c0_81, %c0_82], %153 {strides = array<i32>} : memref<1x8x32xf32, #tpu.memory_space<vmem>>, vector<1x8x32xf32>,
    %c0_83 = arith.constant 0 : index
    %c0_84 = arith.constant 0 : index
    %c0_85 = arith.constant 0 : index
    %155 = vector.load %arg14[%c0_83, %c0_84, %c0_85] : memref<1x1x32xf32, #tpu.memory_space<vmem>>, vector<1x1x32xf32>
    %156 = vector.shape_cast %155 : vector<1x1x32xf32> to vector<1x32xf32>
    %c0_86 = arith.constant 0 : index
    %c0_87 = arith.constant 0 : index
    %c0_88 = arith.constant 0 : index
    %157 = vector.load %arg15[%c0_86, %c0_87, %c0_88] : memref<1x1x32xf32, #tpu.memory_space<vmem>>, vector<1x1x32xf32>
    %158 = vector.shape_cast %157 : vector<1x1x32xf32> to vector<1x32xf32>
    %cst_89 = arith.constant dense<0.000000e+00> : vector<1x8xf32>
    %159 = vector.multi_reduction <add>, %153, %cst_89 [2] : vector<1x8x32xf32> to vector<1x8xf32>
    %160 = vector.shape_cast %159 : vector<1x8xf32> to vector<1x8x1xf32>
    %cst_90 = arith.constant 3.200000e+01 : f32
    %161 = vector.broadcast %cst_90 : f32 to vector<1x8x1xf32>
    %162 = arith.divf %160, %161 : vector<1x8x1xf32>
    %163 = vector.broadcast %162 : vector<1x8x1xf32> to vector<1x8x32xf32>
    %164 = arith.subf %153, %163 : vector<1x8x32xf32>
    %165 = arith.mulf %164, %164 : vector<1x8x32xf32>
    %cst_91 = arith.constant dense<0.000000e+00> : vector<1x8xf32>
    %166 = vector.multi_reduction <add>, %165, %cst_91 [2] : vector<1x8x32xf32> to vector<1x8xf32>
    %167 = vector.shape_cast %166 : vector<1x8xf32> to vector<1x8x1xf32>
    %cst_92 = arith.constant 0.0322580636 : f32
    %168 = vector.broadcast %cst_92 : f32 to vector<1x8x1xf32>
    %169 = arith.mulf %167, %168 : vector<1x8x1xf32>
    %170 = vector.broadcast %162 : vector<1x8x1xf32> to vector<1x8x32xf32>
    %171 = arith.subf %153, %170 : vector<1x8x32xf32>
    %172 = vector.shape_cast %156 : vector<1x32xf32> to vector<1x1x32xf32>
    %173 = vector.broadcast %172 : vector<1x1x32xf32> to vector<1x8x32xf32>
    %174 = arith.mulf %173, %171 : vector<1x8x32xf32>
    %175 = math.sqrt %169 : vector<1x8x1xf32>
    %cst_93 = arith.constant 9.99999997E-7 : f32
    %176 = vector.broadcast %cst_93 : f32 to vector<1x8x1xf32>
    %177 = arith.addf %175, %176 : vector<1x8x1xf32>
    %178 = vector.broadcast %177 : vector<1x8x1xf32> to vector<1x8x32xf32>
    %179 = arith.divf %174, %178 : vector<1x8x32xf32>
    %180 = vector.shape_cast %158 : vector<1x32xf32> to vector<1x1x32xf32>
    %181 = vector.broadcast %180 : vector<1x1x32xf32> to vector<1x8x32xf32>
    %182 = arith.addf %179, %181 : vector<1x8x32xf32>
    %183 = vector.shape_cast %182 : vector<1x8x32xf32> to vector<8x32xf32>
    %c0_94 = arith.constant 0 : index
    %c0_95 = arith.constant 0 : index
    %c0_96 = arith.constant 0 : index
    %184 = vector.load %arg16[%c0_94, %c0_95, %c0_96] : memref<1x32x64xf32, #tpu.memory_space<vmem>>, vector<1x32x64xf32>
    %185 = vector.shape_cast %184 : vector<1x32x64xf32> to vector<32x64xf32>
    %cst_97 = arith.constant dense<0.000000e+00> : vector<8x64xf32>
    %186 = tpu.matmul %183, %185, %cst_97 {dimension_numbers = #tpu.dot_dimension_numbers<[1], [0], [0], [1], [0, 0, 1, 1], [], []>} : vector<8x32xf32>, vector<32x64xf32>, vector<8x64xf32> -> vector<8x64xf32>
    %c0_98 = arith.constant 0 : index
    %c0_99 = arith.constant 0 : index
    %c0_100 = arith.constant 0 : index
    %187 = vector.load %arg17[%c0_98, %c0_99, %c0_100] : memref<1x1x64xf32, #tpu.memory_space<vmem>>, vector<1x1x64xf32>
    %188 = vector.shape_cast %187 : vector<1x1x64xf32> to vector<1x64xf32>
    %189 = vector.broadcast %188 : vector<1x64xf32> to vector<8x64xf32>
    %190 = arith.addf %186, %189 : vector<8x64xf32>
    %cst_101 = arith.constant 0.000000e+00 : f32
    %191 = vector.broadcast %cst_101 : f32 to vector<8x64xf32>
    %192 = arith.maximumf %190, %191 : vector<8x64xf32>
    %c0_102 = arith.constant 0 : index
    %c0_103 = arith.constant 0 : index
    %c0_104 = arith.constant 0 : index
    %193 = vector.load %arg18[%c0_102, %c0_103, %c0_104] : memref<1x64x32xf32, #tpu.memory_space<vmem>>, vector<1x64x32xf32>
    %194 = vector.shape_cast %193 : vector<1x64x32xf32> to vector<64x32xf32>
    %cst_105 = arith.constant dense<0.000000e+00> : vector<8x32xf32>
    %195 = tpu.matmul %192, %194, %cst_105 {dimension_numbers = #tpu.dot_dimension_numbers<[1], [0], [0], [1], [0, 0, 1, 1], [], []>} : vector<8x64xf32>, vector<64x32xf32>, vector<8x32xf32> -> vector<8x32xf32>
    %c0_106 = arith.constant 0 : index
    %c0_107 = arith.constant 0 : index
    %c0_108 = arith.constant 0 : index
    %196 = vector.load %arg19[%c0_106, %c0_107, %c0_108] : memref<1x1x32xf32, #tpu.memory_space<vmem>>, vector<1x1x32xf32>
    %197 = vector.shape_cast %196 : vector<1x1x32xf32> to vector<1x32xf32>
    %198 = vector.broadcast %197 : vector<1x32xf32> to vector<8x32xf32>
    %199 = arith.addf %195, %198 : vector<8x32xf32>
    %200 = vector.shape_cast %199 : vector<8x32xf32> to vector<1x8x32xf32>
    %201 = arith.addf %153, %200 : vector<1x8x32xf32>
    %c0_109 = arith.constant 0 : index
    %c0_110 = arith.constant 0 : index
    %c0_111 = arith.constant 0 : index
    %202 = vector.load %arg24[%c0_109, %c0_110, %c0_111] : memref<1x8x32xf32, #tpu.memory_space<vmem>>, vector<1x8x32xf32>
    tpu.vector_store %arg24[%c0_109, %c0_110, %c0_111], %201 {strides = array<i32>} : memref<1x8x32xf32, #tpu.memory_space<vmem>>, vector<1x8x32xf32>,
    %c1_i32 = arith.constant 1 : i32
    %203 = arith.cmpi eq, %arg1, %c1_i32 : i32
    %204 = arith.extui %203 : i1 to i32
    %c0_i32_112 = arith.constant 0 : i32
    %205 = arith.cmpi ne, %204, %c0_i32_112 : i32
    scf.if %205 {
      %c0_113 = arith.constant 0 : index
      %c0_114 = arith.constant 0 : index
      %c0_115 = arith.constant 0 : index
      %206 = vector.load %arg24[%c0_113, %c0_114, %c0_115] : memref<1x8x32xf32, #tpu.memory_space<vmem>>, vector<1x8x32xf32>
      %c0_116 = arith.constant 0 : index
      %c0_117 = arith.constant 0 : index
      %207 = vector.load %arg20[%c0_116, %c0_117] : memref<1x32xf32, #tpu.memory_space<vmem>>, vector<1x32xf32>
      %c0_118 = arith.constant 0 : index
      %c0_119 = arith.constant 0 : index
      %208 = vector.load %arg21[%c0_118, %c0_119] : memref<1x32xf32, #tpu.memory_space<vmem>>, vector<1x32xf32>
      %cst_120 = arith.constant dense<0.000000e+00> : vector<1x8xf32>
      %209 = vector.multi_reduction <add>, %206, %cst_120 [2] : vector<1x8x32xf32> to vector<1x8xf32>
      %210 = vector.shape_cast %209 : vector<1x8xf32> to vector<1x8x1xf32>
      %cst_121 = arith.constant 3.200000e+01 : f32
      %211 = vector.broadcast %cst_121 : f32 to vector<1x8x1xf32>
      %212 = arith.divf %210, %211 : vector<1x8x1xf32>
      %213 = vector.broadcast %212 : vector<1x8x1xf32> to vector<1x8x32xf32>
      %214 = arith.subf %206, %213 : vector<1x8x32xf32>
      %215 = arith.mulf %214, %214 : vector<1x8x32xf32>
      %cst_122 = arith.constant dense<0.000000e+00> : vector<1x8xf32>
      %216 = vector.multi_reduction <add>, %215, %cst_122 [2] : vector<1x8x32xf32> to vector<1x8xf32>
      %217 = vector.shape_cast %216 : vector<1x8xf32> to vector<1x8x1xf32>
      %cst_123 = arith.constant 0.0322580636 : f32
      %218 = vector.broadcast %cst_123 : f32 to vector<1x8x1xf32>
      %219 = arith.mulf %217, %218 : vector<1x8x1xf32>
      %220 = vector.broadcast %212 : vector<1x8x1xf32> to vector<1x8x32xf32>
      %221 = arith.subf %206, %220 : vector<1x8x32xf32>
      %222 = vector.shape_cast %207 : vector<1x32xf32> to vector<1x1x32xf32>
      %223 = vector.broadcast %222 : vector<1x1x32xf32> to vector<1x8x32xf32>
      %224 = arith.mulf %223, %221 : vector<1x8x32xf32>
      %225 = math.sqrt %219 : vector<1x8x1xf32>
      %cst_124 = arith.constant 9.99999997E-7 : f32
      %226 = vector.broadcast %cst_124 : f32 to vector<1x8x1xf32>
      %227 = arith.addf %225, %226 : vector<1x8x1xf32>
      %228 = vector.broadcast %227 : vector<1x8x1xf32> to vector<1x8x32xf32>
      %229 = arith.divf %224, %228 : vector<1x8x32xf32>
      %230 = vector.shape_cast %208 : vector<1x32xf32> to vector<1x1x32xf32>
      %231 = vector.broadcast %230 : vector<1x1x32xf32> to vector<1x8x32xf32>
      %232 = arith.addf %229, %231 : vector<1x8x32xf32>
      %c0_125 = arith.constant 0 : index
      %c0_126 = arith.constant 0 : index
      %c0_127 = arith.constant 0 : index
      %233 = vector.load %arg22[%c0_125, %c0_126, %c0_127] : memref<1x8x32xf32, #tpu.memory_space<vmem>>, vector<1x8x32xf32>
      tpu.vector_store %arg22[%c0_125, %c0_126, %c0_127], %232 {strides = array<i32>} : memref<1x8x32xf32, #tpu.memory_space<vmem>>, vector<1x8x32xf32>,
    } else {
    }
    return
  }
  func.func @transform_0(%arg0: i32, %arg1: i32) -> (i32, i32, i32) {
    %c0_i32 = arith.constant 0 : i32
    %c0_i32_0 = arith.constant 0 : i32
    %c0_i32_1 = arith.constant 0 : i32
    return %arg0, %c0_i32, %c0_i32_0 : i32, i32, i32
  }
  func.func @transform_1(%arg0: i32, %arg1: i32) -> (i32, i32, i32) {
    %c0_i32 = arith.constant 0 : i32
    %c0_i32_0 = arith.constant 0 : i32
    %c0_i32_1 = arith.constant 0 : i32
    return %arg0, %c0_i32, %c0_i32_0 : i32, i32, i32
  }
  func.func @transform_2(%arg0: i32, %arg1: i32) -> (i32, i32, i32) {
    %c0_i32 = arith.constant 0 : i32
    %c0_i32_0 = arith.constant 0 : i32
    %c0_i32_1 = arith.constant 0 : i32
    return %arg1, %c0_i32, %c0_i32_0 : i32, i32, i32
  }
  func.func @transform_3(%arg0: i32, %arg1: i32) -> (i32, i32, i32) {
    %c0_i32 = arith.constant 0 : i32
    %c0_i32_0 = arith.constant 0 : i32
    %c0_i32_1 = arith.constant 0 : i32
    return %arg1, %c0_i32, %c0_i32_0 : i32, i32, i32
  }
  func.func @transform_4(%arg0: i32, %arg1: i32) -> (i32, i32, i32) {
    %c0_i32 = arith.constant 0 : i32
    %c0_i32_0 = arith.constant 0 : i32
    %c0_i32_1 = arith.constant 0 : i32
    return %arg1, %c0_i32, %c0_i32_0 : i32, i32, i32
  }
  func.func @transform_5(%arg0: i32, %arg1: i32) -> (i32, i32, i32) {
    %c0_i32 = arith.constant 0 : i32
    %c0_i32_0 = arith.constant 0 : i32
    %c0_i32_1 = arith.constant 0 : i32
    return %arg1, %c0_i32, %c0_i32_0 : i32, i32, i32
  }
  func.func @transform_6(%arg0: i32, %arg1: i32) -> (i32, i32, i32) {
    %c0_i32 = arith.constant 0 : i32
    %c0_i32_0 = arith.constant 0 : i32
    %c0_i32_1 = arith.constant 0 : i32
    return %arg1, %c0_i32, %c0_i32_0 : i32, i32, i32
  }
  func.func @transform_7(%arg0: i32, %arg1: i32) -> (i32, i32, i32) {
    %c0_i32 = arith.constant 0 : i32
    %c0_i32_0 = arith.constant 0 : i32
    %c0_i32_1 = arith.constant 0 : i32
    return %arg1, %c0_i32, %c0_i32_0 : i32, i32, i32
  }
  func.func @transform_8(%arg0: i32, %arg1: i32) -> (i32, i32, i32) {
    %c0_i32 = arith.constant 0 : i32
    %c0_i32_0 = arith.constant 0 : i32
    %c0_i32_1 = arith.constant 0 : i32
    return %arg1, %c0_i32, %c0_i32_0 : i32, i32, i32
  }
  func.func @transform_9(%arg0: i32, %arg1: i32) -> (i32, i32, i32) {
    %c0_i32 = arith.constant 0 : i32
    %c0_i32_0 = arith.constant 0 : i32
    %c0_i32_1 = arith.constant 0 : i32
    return %arg1, %c0_i32, %c0_i32_0 : i32, i32, i32
  }
  func.func @transform_10(%arg0: i32, %arg1: i32) -> (i32, i32, i32) {
    %c0_i32 = arith.constant 0 : i32
    %c0_i32_0 = arith.constant 0 : i32
    %c0_i32_1 = arith.constant 0 : i32
    return %arg1, %c0_i32, %c0_i32_0 : i32, i32, i32
  }
  func.func @transform_11(%arg0: i32, %arg1: i32) -> (i32, i32, i32) {
    %c0_i32 = arith.constant 0 : i32
    %c0_i32_0 = arith.constant 0 : i32
    %c0_i32_1 = arith.constant 0 : i32
    return %arg1, %c0_i32, %c0_i32_0 : i32, i32, i32
  }
  func.func @transform_12(%arg0: i32, %arg1: i32) -> (i32, i32, i32) {
    %c0_i32 = arith.constant 0 : i32
    %c0_i32_0 = arith.constant 0 : i32
    %c0_i32_1 = arith.constant 0 : i32
    return %arg1, %c0_i32, %c0_i32_0 : i32, i32, i32
  }
  func.func @transform_13(%arg0: i32, %arg1: i32) -> (i32, i32, i32) {
    %c0_i32 = arith.constant 0 : i32
    %c0_i32_0 = arith.constant 0 : i32
    %c0_i32_1 = arith.constant 0 : i32
    return %arg1, %c0_i32, %c0_i32_0 : i32, i32, i32
  }
  func.func @transform_14(%arg0: i32, %arg1: i32) -> (i32, i32, i32) {
    %c0_i32 = arith.constant 0 : i32
    %c0_i32_0 = arith.constant 0 : i32
    %c0_i32_1 = arith.constant 0 : i32
    return %arg1, %c0_i32, %c0_i32_0 : i32, i32, i32
  }
  func.func @transform_15(%arg0: i32, %arg1: i32) -> (i32, i32, i32) {
    %c0_i32 = arith.constant 0 : i32
    %c0_i32_0 = arith.constant 0 : i32
    %c0_i32_1 = arith.constant 0 : i32
    return %arg1, %c0_i32, %c0_i32_0 : i32, i32, i32
  }
  func.func @transform_16(%arg0: i32, %arg1: i32) -> (i32, i32, i32) {
    %c0_i32 = arith.constant 0 : i32
    %c0_i32_0 = arith.constant 0 : i32
    %c0_i32_1 = arith.constant 0 : i32
    return %arg1, %c0_i32, %c0_i32_0 : i32, i32, i32
  }
  func.func @transform_17(%arg0: i32, %arg1: i32) -> (i32, i32, i32) {
    %c0_i32 = arith.constant 0 : i32
    %c0_i32_0 = arith.constant 0 : i32
    %c0_i32_1 = arith.constant 0 : i32
    return %arg1, %c0_i32, %c0_i32_0 : i32, i32, i32
  }
  func.func @transform_18(%arg0: i32, %arg1: i32) -> (i32, i32) {
    %c0_i32 = arith.constant 0 : i32
    %c0_i32_0 = arith.constant 0 : i32
    %c0_i32_1 = arith.constant 0 : i32
    return %c0_i32, %c0_i32_0 : i32, i32
  }
  func.func @transform_19(%arg0: i32, %arg1: i32) -> (i32, i32) {
    %c0_i32 = arith.constant 0 : i32
    %c0_i32_0 = arith.constant 0 : i32
    %c0_i32_1 = arith.constant 0 : i32
    return %c0_i32, %c0_i32_0 : i32, i32
  }
  func.func @transform_20(%arg0: i32, %arg1: i32) -> (i32, i32, i32) {
    %c0_i32 = arith.constant 0 : i32
    %c0_i32_0 = arith.constant 0 : i32
    %c0_i32_1 = arith.constant 0 : i32
    return %arg0, %c0_i32, %c0_i32_0 : i32, i32, i32
  }
  func.func @transform_21(%arg0: i32, %arg1: i32) -> (i32, i32, i32, i32, i32) {
    %c0_i32 = arith.constant 0 : i32
    %c0_i32_0 = arith.constant 0 : i32
    %c0_i32_1 = arith.constant 0 : i32
    %c0_i32_2 = arith.constant 0 : i32
    return %arg0, %arg1, %c0_i32, %c0_i32_0, %c0_i32_1 : i32, i32, i32, i32, i32
  }
}

</mosaic_0001>

<bundles_post_ra>
// kernel: tpu_custom_call.1
= control target key start
LH: loop header
LB: loop body
LE: loop exit
PB: predicated region body
PF: predicated region fallthrough
CT: control target
= control target key end

     0   :  { %s5789_s0 = inlined_call_operand.hbm [shape: f32[2,8,32], index: 0, kind: input, shape index: {}, may-alias: {0,20}]   ;;  %s5790_s1 = inlined_call_operand.hbm [shape: f32[2,1,8], index: 1, kind: input, shape index: {}]   ;;  %s5791_s2 = inlined_call_operand.hbm [shape: f32[2,1,32], index: 2, kind: input, shape index: {}]   ;;  %s5792_s3 = inlined_call_operand.hbm [shape: f32[2,1,32], index: 3, kind: input, shape index: {}]   ;;  %s5793_s4 = inlined_call_operand.hbm [shape: f32[2,32,32], index: 4, kind: input, shape index: {}]   ;;  %s5794_s5 = inlined_call_operand.hbm [shape: f32[2,1,32], index: 5, kind: input, shape index: {}]   ;;  %s5795_s6 = inlined_call_operand.hbm [shape: f32[2,32,32], index: 6, kind: input, shape index: {}]   ;;  %s5796_s7 = inlined_call_operand.hbm [shape: f32[2,1,32], index: 7, kind: input, shape index: {}]   ;;  %s5797_s8 = inlined_call_operand.hbm [shape: f32[2,32,32], index: 8, kind: input, shape index: {}]   ;;  %s5798_s9 = inlined_call_operand.hbm [shape: f32[2,1,32], index: 9, kind: input, shape index: {}]   ;;  %s5799_s10 = inlined_call_operand.hbm [shape: f32[2,32,32], index: 10, kind: input, shape index: {}]   ;;  %s5800_s11 = inlined_call_operand.hbm [shape: f32[2,1,32], index: 11, kind: input, shape index: {}]   ;;  %s5801_s12 = inlined_call_operand.hbm [shape: f32[2,1,32], index: 12, kind: input, shape index: {}]   ;;  %s5802_s13 = inlined_call_operand.hbm [shape: f32[2,1,32], index: 13, kind: input, shape index: {}]   ;;  %s5803_s14 = inlined_call_operand.hbm [shape: f32[2,32,64], index: 14, kind: input, shape index: {}]   ;;  %s5804_s15 = inlined_call_operand.hbm [shape: f32[2,1,64], index: 15, kind: input, shape index: {}]   ;;  %s5805_s16 = inlined_call_operand.hbm [shape: f32[2,64,32], index: 16, kind: input, shape index: {}]   ;;  %s5806_s17 = inlined_call_operand.hbm [shape: f32[2,1,32], index: 17, kind: input, shape index: {}]   ;;  %s5807_s18 = inlined_call_operand.hbm [shape: f32[1,32], index: 18, kind: input, shape index: {}]   ;;  %s5808_s19 = inlined_call_operand.hbm [shape: f32[1,32], index: 19, kind: input, shape index: {}]   ;;  %s5809_s20 = inlined_call_operand.hbm [shape: f32[2,8,32], index: 20, kind: output, shape index: {0}, may-alias: {0,20}]   ;;  %s5810_s21 = inlined_call_operand.hbm [shape: bf16[2,2,4,8,8], index: 21, kind: output, shape index: {1}]  }
   0x1   :  { %5875 = sst [smem:[#allocation74_spill]] %s5789_s0 }
   0x2   :  { %5876 = sst [smem:[#allocation75_spill]] %s5790_s1 }
   0x3   :  { %5877 = sst [smem:[#allocation76_spill]] %s5791_s2 }
   0x4   :  { %5878 = sst [smem:[#allocation77_spill]] %s5792_s3 }
   0x5   :  { %5879 = sst [smem:[#allocation78_spill]] %s5793_s4 }
   0x6   :  { %5880 = sst [smem:[#allocation79_spill]] %s5794_s5 }
   0x7   :  { %5881 = sst [smem:[#allocation80_spill]] %s5795_s6 }
   0x8   :  { %5882 = sst [smem:[#allocation81_spill]] %s5796_s7 }
   0x9   :  { %5883 = sst [smem:[#allocation82_spill]] %s5797_s8 }
   0xa   :  { %5884 = sst [smem:[#allocation83_spill]] %s5798_s9 }
   0xb   :  { %5885 = sst [smem:[#allocation84_spill]] %s5799_s10 }
   0xc   :  { %5886 = sst [smem:[#allocation85_spill]] %s5800_s11 }
   0xd   :  { %5887 = sst [smem:[#allocation86_spill]] %s5801_s12 }
   0xe   :  { %5888 = sst [smem:[#allocation87_spill]] %s5802_s13 }
   0xf   :  { %5889 = sst [smem:[#allocation88_spill]] %s5803_s14 }
  0x10   :  { %5890 = sst [smem:[#allocation89_spill]] %s5804_s15 }
  0x11   :  { %5891 = sst [smem:[#allocation90_spill]] %s5805_s16 }
  0x12   :  { %5892 = sst [smem:[#allocation91_spill]] %s5806_s17 }
  0x13   :  { %5893 = sst [smem:[#allocation92_spill]] %s5807_s18 }
  0x14   :  { %5894 = sst [smem:[#allocation93_spill]] %s5808_s19 }
  0x15   :  { %5895 = sst [smem:[#allocation94_spill]] %s5809_s20 }
  0x16   :  { %5896 = sst [smem:[#allocation95_spill]] %s5810_s21 }
  0x17   :  { %27 = vsyncpa [#allocation4], 0 }
  0x18   :  { %29 = vsyncpa [#allocation4 + $0x1], 0 }
  0x19   :  { %30 = vsyncpa [#allocation7], 0 }
  0x1a   :  { %32 = vsyncpa [#allocation7 + $0x1], 0 }
  0x1b   :  { %33 = vsyncpa [#allocation10], 0 }
  0x1c   :  { %35 = vsyncpa [#allocation10 + $0x1], 0 }
  0x1d   :  { %36 = vsyncpa [#allocation13], 0 }
  0x1e   :  { %38 = vsyncpa [#allocation13 + $0x1], 0 }
  0x1f   :  { %39 = vsyncpa [#allocation16], 0 }
  0x20   :  { %41 = vsyncpa [#allocation16 + $0x1], 0 }
  0x21   :  { %42 = vsyncpa [#allocation19], 0 }
  0x22   :  { %44 = vsyncpa [#allocation19 + $0x1], 0 }
  0x23   :  { %45 = vsyncpa [#allocation22], 0 }
  0x24   :  { %47 = vsyncpa [#allocation22 + $0x1], 0 }
  0x25   :  { %48 = vsyncpa [#allocation25], 0 }
  0x26   :  { %50 = vsyncpa [#allocation25 + $0x1], 0 }
  0x27   :  { %51 = vsyncpa [#allocation28], 0 }
  0x28   :  { %53 = vsyncpa [#allocation28 + $0x1], 0 }
  0x29   :  { %54 = vsyncpa [#allocation31], 0 }
  0x2a   :  { %56 = vsyncpa [#allocation31 + $0x1], 0 }
  0x2b   :  { %57 = vsyncpa [#allocation34], 0 }
  0x2c   :  { %58 = vsyncpa [#allocation5], 0 }
  0x2d   :  { %60 = vsyncpa [#allocation5 + $0x1], 0 }
  0x2e   :  { %61 = vsyncpa [#allocation37], 0 }
  0x2f   :  { %63 = vsyncpa [#allocation37 + $0x1], 0  ;;  %s4604_s2 = smov 0   ;;  %s4606_s25 = smov 0  }
  0x30   :  { %s4608_s26 = smov 0   ;;  %s4610_s27 = smov 0  }
  0x31   :  { %s4612_s3 = smov 0   ;;  %s4614_s28 = smov 0  }
  0x32   :  { %s4616_s29 = smov 0   ;;  %s4618_s0 = smov 0  }
  0x33   :  { %s4620_s4 = smov 0   ;;  %s4622_s30 = smov 0  }
  0x34   :  { %s4624_s5 = smov 0   ;;  %s4626_s22 = smov 0  }
  0x35   :  { %s4628_s23 = smov 0   ;;  %s4630_s1 = smov 0  }
  0x36 LB: > { %5897 = sst [smem:[#allocation53_spill]] %s4405_s2  ;;  %s4675_s24 = sadd.s32 4294967295, %s4457_s1   ;;  %s4457_s1 = sphi %s4630_s1, %s69_s1   ;;  %s4453_s23 = sphi %s4628_s23, %s6011_s23   ;;  %s4449_s22 = sphi %s4626_s22, %s6020_s22   ;;  %s4445_s5 = sphi %s4624_s5, %s6019_s5   ;;  %s4441_s30 = sphi %s4622_s30, %s6018_s30   ;;  %s4437_s4 = sphi %s4620_s4, %s6008_s4   ;;  %s4433_s0 = sphi %s4618_s0, %s6017_s0   ;;  %s4429_s29 = sphi %s4616_s29, %s6016_s29   ;;  %s4425_s28 = sphi %s4614_s28, %s6006_s28   ;;  %s4421_s3 = sphi %s4612_s3, %s6015_s3   ;;  %s4417_s27 = sphi %s4610_s27, %s6014_s27   ;;  %s4413_s26 = sphi %s4608_s26, %s6013_s26   ;;  %s4409_s25 = sphi %s4606_s25, %s6003_s25   ;;  %s4405_s2 = sphi %s4604_s2, %s6002_s2  }
  0x37   : > { %5898 = sst [smem:[#allocation54_spill]] %s4409_s25  ;;  %s3146_s21 = sadd.s32 4294967294, %s4457_s1  }
  0x38   : > { %5899 = sst [smem:[#allocation55_spill]] %s4413_s26  ;;  %s78_s20 = sadd.s32 1, %s4449_s22 }
  0x39   : > { %5900 = sst [smem:[#allocation56_spill]] %s4425_s28  ;;  %p79_p0 = scmp.ge.s32.totalorder %s78_s20, 2 }
  0x3a   : > { %5901 = sst [smem:[#allocation57_spill]] %s4429_s29  ;;  %p95_p1 = scmp.ne.s32.totalorder %s4437_s4, %s4433_s0 }
  0x3b   : > { %5902 = sst [smem:[#allocation58_spill]] %s4437_s4  ;;  %p96_p2 = scmp.eq.s32.totalorder %s4457_s1, 0 }
  0x3c   : > { %5903 = sst [smem:[#allocation59_spill]] %s4441_s30  ;;  %s88_s30 = sadd.s32 1, %s4437_s4 }
  0x3d   : > { %5904 = sst [smem:[#allocation60_spill]] %s4445_s5  ;;  %s81_s5 = sadd.s32 1, %s4453_s23 }
  0x3e   : > { %5905 = sst [smem:[#allocation61_spill]] %s4453_s23  ;;  %s6022_s20 = smov (%p79_p0, %s78_s20), 0 }
  0x3f   : > { %5906 = sst [smem:[#allocation62_spill]] %s4457_s1  ;;  %s6024_s5 = smov (!%p79_p0, %s81_s5), %s4453_s23 }
  0x40   : > { %5907 = sst [smem:[#allocation63_spill]] %s6022_s20  ;;  %p4692_p3 = por %p96_p2, %p95_p1 }
  0x41   : > { %p101_p4 = scmp.ne.s32.totalorder %s4433_s0, %s4429_s29  ;;  %p83_p5 = scmp.ge.s32.totalorder %s6024_s5, 2 }
  0x42   : > { %s5908_s17 = scalar_select %p4692_p3, 1, 0 }
  0x43   : > { %p5832_p6 = scmp.eq.s32.totalorder %s4675_s24, 0  ;;  %s137_s16 = ssub.s32 %s4449_s22, %s6022_s20 }
  0x44   : > { %s140_s14 = sadd.s32 1, %s4425_s28  ;;  %s6026_s5 = smov (%p83_p5, %s6024_s5), 0 }
  0x45   : > { %5909 = sst [smem:[#allocation64_spill]] %s6026_s5  ;;  %p4709_p7 = por %p5832_p6, %p101_p4 }
  0x46   : > { %p138_p8 = scmp.eq.s32.totalorder %s137_s16, 0  ;;  %s85_s10 = ssub.s32 %s4453_s23, %s6026_s5 }
  0x47   : > { %s5910_s12 = scalar_select %p4709_p7, 1, 0 }
  0x48   : > { %p147_p9 = scmp.ne.s32.totalorder %s4425_s28, %s4421_s3  ;;  %p86_p10 = scmp.eq.s32.totalorder %s85_s10, 0 }
  0x49   : > { %5911 = sst [smem:[#allocation65_spill]] %s5910_s12  ;;  %p153_p11 = scmp.ne.s32.totalorder %s4421_s3, %s4417_s27 }
  0x4a   : > { %s4720_s20 = scalar_select %p138_p8, %s4425_s28, %s140_s14  }
  0x4b   : > { %s4723_s8 = scalar_select %p86_p10, %s4437_s4, %s88_s30  }
  0x4c   : > { %5912 = sst [smem:[#allocation66_spill]] %s4720_s20  ;;  %p4727_p12 = por %p147_p9, %p96_p2 }
  0x4d   : > { %5913 = sst [smem:[#allocation67_spill]] %s4723_s8  ;;  %p4733_p13 = por %p153_p11, %p5832_p6 }
  0x4e   : > { %s5914_s6 = scalar_select %p4727_p12, 1, 0 }
  0x4f   : > { %s5915_s5 = scalar_select %p4733_p13, 1, 0 }
  0x50   : > { %p609_p0 = scmp.eq.s32.totalorder %s4675_s24, 3  ;;  %p615_p5 = scmp.eq.s32.totalorder %s3146_s21, 3 }
  0x51   : > { %5916 = sst [smem:[#allocation68_spill]] %s5915_s5  ;;  %s623_s12 = sor.u32 %s137_s16, %s85_s10 }
  0x52   : > { %s626_s15 = sadd.s32 1, %s4413_s26  ;;  %p4742_p8 = por %p609_p0, %p95_p1 }
  0x53   : > { %p4749_p10 = por %p615_p5, %p101_p4  ;;  %p624_p2 = scmp.eq.s32.totalorder %s623_s12, 0 }
  0x54   : > { %s5917_s14 = scalar_select %p4742_p8, 1, 0 }
  0x55   : > { %s5919_s27 = scalar_select %p4749_p10, 1, 0 }
  0x56   : > { %5918 = sst [smem:[#allocation69_spill]] %s5917_s14  ;;  %p636_p9 = scmp.ne.s32.totalorder %s4413_s26, %s4409_s25 }
  0x57   : > { %5920 = sst [smem:[#allocation70_spill]] %s5919_s27  ;;  %p642_p11 = scmp.ne.s32.totalorder %s4409_s25, %s4405_s2 }
  0x58   : > { %p3147_p6 = scmp.ge.s32.totalorder %s4457_s1, 1  ;;  %p4761_p13 = por %p636_p9, %p609_p0 }
  0x59   : > { %s4759_s30 = scalar_select %p624_p2, %s4413_s26, %s626_s15  }
  0x5a   : > { %s5922_s10 = scalar_select %p4761_p13, 1, 0 }
  0x5b   : > { %5921 = sst [smem:[#allocation71_spill]] %s4759_s30  ;;  %p4765_p1 = por %p642_p11, %p615_p5 }
  0x5c   : > { %5923 = sst [smem:[#allocation72_spill]] %s5922_s10  ;;  %p650_p8 = scmp.lt.s32.totalorder %s4457_s1, 5 }
  0x5d   : > { %s5924_s16 = scalar_select %p4765_p1, 1, 0 }
  0x5e   : > { %p4770_p4 = pnand %p3147_p6, %p650_p8  ;;  %s4459_s12 = smov [#allocation32]  }
  0x5f   : > { %5925 = sst [smem:[#allocation73_spill]] %s5924_s16  ;;  %s663_s8 = sshll.u32 %s4459_s12, 4  ;;  %s664_s8 = int_to_ptr.vmem [resolvable:$true] %s663_s8 }
  0x60   : > { %s5926_s21 = scalar_select %p4770_p4, 1, 0 }
  0x61   : > { %p3497_p10 = pneg %p4770_p4  ;;  %s4460_s15 = smov [#allocation33]  }
  0x62   : > { %s674_s20 = sshll.u32 %s4460_s15, 4  ;;  %p5927_p0 = scmp.eq.s32.totalorder %s4675_s24, 0  ;;  %s4782_s20 = int_to_ptr.vmem [resolvable:$true] %s674_s20 }
  0x63   : > { %s5929_s18 = sld [smem:[#allocation92_spill]] }
  0x64   : > { %p4778_p2 = pnand %p3497_p10, %p5927_p0 }
  0x66   : > { %p3673_p5 = pneg %p4778_p2 }
  0x69   : > { %s3671_s2 = scalar_lea.hbm %s5929_s18, 16 }
  0x6a   : > { %p3672_p6 = scmp.ne.s32.totalorder %s5929_s18, %s3671_s2  ;;  %p3678_p9 = scmp.lt.u32.totalorder %s3671_s2, %s5929_s18 }
  0x6c   : > { %p3674_p8 = pnand %p3673_p5, %p3672_p6 }
  0x6e   : > { %p3675_p10 = pneg %p3674_p8 }
  0x70   : > { %p3680_p11 = pnand %p3678_p9, %p3675_p10 }
  0x72   : > { %3683 = shalt.err (!%p3680_p11)
}
  0x73   : > { %s3684_s10 = scalar_lea.vmem %s664_s8, 16  ;;  %s3691_s26 = scalar_lea.vmem %s664_s8, 32 }
  0x74   : > { %p3685_p0 = scmp.ne.s32.totalorder %s664_s8, %s3684_s10  ;;  %p3692_p7 = scmp.lt.s32.totalorder %s664_s8, %s664_s8 }
  0x75   : > { %p3693_p4 = scmp.lt.s32.totalorder %s3691_s26, %s3684_s10 }
  0x76   : > { %p3687_p1 = pnand %p3685_p0, %p3673_p5 }
  0x77   : > { %p3694_p12 = por %p3693_p4, %p3692_p7 }
  0x78   : > { %p3688_p13 = pneg %p3687_p1 }
  0x7a   : > { %p3695_p3 = pnand %p3694_p12, %p3688_p13 }
  0x7c   : > { %3698 = shalt.err (!%p3695_p3)
}
  0x7d   : > { %3500 = dma.hbm_to_vmem [thread:$0]  (!%p4778_p2), %s5929_s18, 16, %s664_s8, [#allocation31]  }
  0x7e   : > { %s5930_s19 = sld [smem:[#allocation93_spill]] }
  0x84   : > { %s3699_s12 = scalar_lea.hbm %s5930_s19, 16 }
  0x85   : > { %p3700_p1 = scmp.ne.s32.totalorder %s5930_s19, %s3699_s12  ;;  %p3706_p3 = scmp.lt.u32.totalorder %s3699_s12, %s5930_s19 }
  0x87   : > { %p3702_p7 = pnand %p3700_p1, %p3673_p5 }
  0x89   : > { %p3703_p12 = pneg %p3702_p7 }
  0x8b   : > { %p3708_p13 = pnand %p3706_p3, %p3703_p12 }
  0x8d   : > { %3711 = shalt.err (!%p3708_p13)
}
  0x8e   : > { %s3712_s8 = scalar_lea.vmem %s4782_s20, 16  ;;  %s3719_s14 = scalar_lea.vmem %s4782_s20, 32 }
  0x8f   : > { %p3713_p4 = scmp.ne.s32.totalorder %s4782_s20, %s3712_s8  ;;  %p3720_p10 = scmp.lt.s32.totalorder %s4782_s20, %s4782_s20 }
  0x90   : > { %p3721_p9 = scmp.lt.s32.totalorder %s3719_s14, %s3712_s8 }
  0x91   : > { %p3715_p6 = pnand %p3713_p4, %p3673_p5 }
  0x92   : > { %p3722_p11 = por %p3721_p9, %p3720_p10 }
  0x93   : > { %p3716_p8 = pneg %p3715_p6 }
  0x95   : > { %p3723_p0 = pnand %p3722_p11, %p3716_p8 }
  0x97   : > { %3726 = shalt.err (!%p3723_p0)
}
  0x98   : > { %3503 = dma.hbm_to_vmem [thread:$0]  (!%p4778_p2), %s5930_s19, 16, %s4782_s20, [#allocation34]  }
  0x99   : > { %p3150_p1 = scmp.ge.s32.totalorder %s4457_s1, 4 }
  0x9a   : > { %s4834_s2 = sand.u32 (!%p3150_p1), 1, %s4437_s4   ;;  %s4837_s16 = sand.u32 (!%p3150_p1), 1, %s4457_s1  }
  0x9b   : > { %681 = sbr.rel (%p3150_p1) target bundleno = 646 (0x286), region = 24  ;;  %s3153_s12 = sshll.u32 (!%p3150_p1), %s4453_s23, 4 }
  0x9c   : > { %s706_s30 = scalar_lea.vmem (!%p3150_p1), [#allocation6], %s4834_s2  ;;  %s5931_s8 = sld [smem:[#allocation75_spill]] (!%p3150_p1) }
  0x9d   : > { %s713_s15 = sshll.u32 (!%p3150_p1), %s706_s30, 4  ;;  %s5851_s14 = scalar_lea.sflag (!%p3150_p1), [#allocation7], %s4837_s16  ;;  %s714_s15 = int_to_ptr.vmem [resolvable:$true] %s713_s15 }
  0x9e   : > { %p5932_p5 = scmp.ne.s32.totalorder (!%p3150_p1), %s5908_s17, 0 }
  0xa2   : > { %s4844_s20 = scalar_lea.hbm %s5931_s8, %s3153_s12  ;;  %s3731_s30 = scalar_lea.hbm %s5931_s8, 32 }
  0xa3   : > { %s3727_s27 = scalar_lea.hbm %s4844_s20, 16  ;;  %p3732_p3 = scmp.lt.u32.totalorder %s4844_s20, %s5931_s8 }
  0xa4   : > { %p3728_p2 = scmp.ne.s32.totalorder %s4844_s20, %s3727_s27  ;;  %p3733_p13 = scmp.lt.u32.totalorder %s3731_s30, %s3727_s27 }
  0xa5   : > { %p3735_p6 = scmp.lt.u32.totalorder %s3727_s27, %s4844_s20 }
  0xa6   : > { %p3729_p7 = pnand %p3728_p2, %p5932_p5  ;;  %p3734_p4 = por %p3733_p13, %p3732_p3 }
  0xa8   : > { %p3730_p12 = pneg %p3729_p7  ;;  %p3736_p8 = por %p3735_p6, %p3734_p4 }
  0xaa   : > { %p3737_p10 = pnand %p3736_p8, %p3730_p12 }
  0xac   : > { %3740 = shalt.err (!%p3737_p10)
}
  0xad   : > { %s3741_s12 = scalar_lea.vmem %s714_s15, 16  ;;  %s4461_s10 = smov [#allocation6]  }
  0xae   : > { %p3742_p9 = scmp.ne.s32.totalorder %s714_s15, %s3741_s12  ;;  %s3745_s26 = sshll.u32 %s4461_s10, 4  ;;  %s3746_s26 = int_to_ptr.vmem [resolvable:$false] %s3745_s26 }
  0xaf   : > { %s3747_s18 = scalar_lea.vmem %s3746_s26, 32  ;;  %p3748_p1 = scmp.lt.s32.totalorder %s714_s15, %s3746_s26 }
  0xb0   : > { %p3743_p11 = pnand %p3742_p9, %p5932_p5  ;;  %p3749_p2 = scmp.lt.s32.totalorder %s3747_s18, %s3741_s12 }
  0xb2   : > { %p3744_p0 = pneg %p3743_p11  ;;  %p3750_p7 = por %p3749_p2, %p3748_p1 }
  0xb4   : > { %p3751_p3 = pnand %p3750_p7, %p3744_p0 }
  0xb6   : > { %3754 = shalt.err (!%p3751_p3)
}
  0xb7   : > { %3454 = dma.hbm_to_vmem [thread:$0]  (%p5932_p5), %s4844_s20, 16, %s714_s15, %s5851_s14  }
  0xb8   : > { %s4867_s19 = sand.u32 1, %s4425_s28   ;;  %s4870_s4 = sshll.u32 %s4449_s22, 4 }
  0xb9   : > { %s5933_s30 = sld [smem:[#allocation77_spill]]  ;;  %s740_s26 = scalar_lea.vmem [#allocation9], %s4867_s19 }
  0xba   : > { %s747_s18 = sshll.u32 %s740_s26, 4  ;;  %p5935_p13 = scmp.ne.s32.totalorder %s5914_s6, 0  ;;  %s748_s18 = int_to_ptr.vmem [resolvable:$true] %s747_s18 }
  0xbf   : > { %s5934_s12 = smov %s5933_s30  ;;  %s4876_s10 = scalar_lea.hbm %s5933_s30, %s4870_s4 }
  0xc0   : > { %s3755_s15 = scalar_lea.hbm %s4876_s10, 16  ;;  %s3759_s28 = scalar_lea.hbm %s5934_s12, 32 }
  0xc1   : > { %p3756_p12 = scmp.ne.s32.totalorder %s4876_s10, %s3755_s15  ;;  %p3760_p8 = scmp.lt.u32.totalorder %s4876_s10, %s5934_s12 }
  0xc2   : > { %p3761_p10 = scmp.lt.u32.totalorder %s3759_s28, %s3755_s15  ;;  %p3763_p11 = scmp.lt.u32.totalorder %s3755_s15, %s4876_s10 }
  0xc3   : > { %p3757_p4 = pnand %p3756_p12, %p5935_p13 }
  0xc4   : > { %p3762_p9 = por %p3761_p10, %p3760_p8 }
  0xc5   : > { %p3758_p6 = pneg %p3757_p4 }
  0xc6   : > { %p3764_p0 = por %p3763_p11, %p3762_p9 }
  0xc8   : > { %p3765_p1 = pnand %p3764_p0, %p3758_p6 }
  0xca   : > { %3768 = shalt.err (!%p3765_p1)
}
  0xcb   : > { %s3769_s30 = scalar_lea.vmem %s748_s18, 16  ;;  %s4462_s26 = smov [#allocation9]  }
  0xcc   : > { %p3770_p2 = scmp.ne.s32.totalorder %s748_s18, %s3769_s30  ;;  %s3773_s8 = sshll.u32 %s4462_s26, 4  ;;  %s3774_s8 = int_to_ptr.vmem [resolvable:$false] %s3773_s8 }
  0xcd   : > { %s3775_s14 = scalar_lea.vmem %s3774_s8, 32  ;;  %p3776_p12 = scmp.lt.s32.totalorder %s748_s18, %s3774_s8 }
  0xce   : > { %p3771_p7 = pnand %p3770_p2, %p5935_p13  ;;  %p3777_p4 = scmp.lt.s32.totalorder %s3775_s14, %s3769_s30 }
  0xd0   : > { %p3772_p3 = pneg %p3771_p7  ;;  %p3778_p5 = por %p3777_p4, %p3776_p12 }
  0xd2   : > { %p3779_p8 = pnand %p3778_p5, %p3772_p3 }
  0xd4   : > { %3782 = shalt.err (!%p3779_p8)
}
  0xd5   : > { %s5936_s28 = scalar_lea.sflag [#allocation10], %s4837_s16  ;;  %s5937_s27 = sld [smem:[#allocation79_spill]] }
  0xd6   : > { %3456 = dma.hbm_to_vmem [thread:$0]  (%p5935_p13), %s4876_s10, 16, %s748_s18, %s5936_s28  }
  0xd7   : > { %s778_s8 = scalar_lea.vmem [#allocation12], %s4867_s19  ;;  %s5857_s26 = scalar_lea.sflag [#allocation13], %s4837_s16 }
  0xd8   : > { %s785_s30 = sshll.u32 %s778_s8, 4  ;;  %s786_s30 = int_to_ptr.vmem [resolvable:$true] %s785_s30 }
  0xdb   : > { %s5938_s12 = smov %s5937_s27  ;;  %s4903_s29 = scalar_lea.hbm %s5937_s27, %s4870_s4 }
  0xdc   : > { %s3783_s14 = scalar_lea.hbm %s4903_s29, 16  ;;  %s3787_s18 = scalar_lea.hbm %s5938_s12, 32 }
  0xdd   : > { %p3784_p5 = scmp.ne.s32.totalorder %s4903_s29, %s3783_s14  ;;  %p3788_p9 = scmp.lt.u32.totalorder %s4903_s29, %s5938_s12 }
  0xde   : > { %p3789_p11 = scmp.lt.u32.totalorder %s3787_s18, %s3783_s14  ;;  %p3791_p1 = scmp.lt.u32.totalorder %s3783_s14, %s4903_s29 }
  0xdf   : > { %p3785_p6 = pnand %p3784_p5, %p5935_p13 }
  0xe0   : > { %p3790_p0 = por %p3789_p11, %p3788_p9 }
  0xe1   : > { %p3786_p10 = pneg %p3785_p6 }
  0xe2   : > { %p3792_p2 = por %p3791_p1, %p3790_p0 }
  0xe4   : > { %p3793_p7 = pnand %p3792_p2, %p3786_p10 }
  0xe6   : > { %3796 = shalt.err (!%p3793_p7)
}
  0xe7   : > { %s3797_s20 = scalar_lea.vmem %s786_s30, 16  ;;  %s4463_s27 = smov [#allocation12]  }
  0xe8   : > { %p3798_p3 = scmp.ne.s32.totalorder %s786_s30, %s3797_s20  ;;  %s3801_s8 = sshll.u32 %s4463_s27, 4  ;;  %s3802_s8 = int_to_ptr.vmem [resolvable:$false] %s3801_s8 }
  0xe9   : > { %s3803_s1 = scalar_lea.vmem %s3802_s8, 32  ;;  %p3804_p8 = scmp.lt.s32.totalorder %s786_s30, %s3802_s8 }
  0xea   : > { %p3799_p12 = pnand %p3798_p3, %p5935_p13  ;;  %p3805_p5 = scmp.lt.s32.totalorder %s3803_s1, %s3797_s20 }
  0xec   : > { %p3800_p4 = pneg %p3799_p12  ;;  %p3806_p6 = por %p3805_p5, %p3804_p8 }
  0xee   : > { %p3807_p9 = pnand %p3806_p6, %p3800_p4 }
  0xf0   : > { %3810 = shalt.err (!%p3807_p9)
}
  0xf1   : > { %3458 = dma.hbm_to_vmem [thread:$0]  (%p5935_p13), %s4903_s29, 16, %s786_s30, %s5857_s26  }
  0xf2   : > { %s5939_s7 = sld [smem:[#allocation81_spill]]  ;;  %s816_s28 = scalar_lea.vmem [#allocation15], %s4867_s19 }
  0xf3   : > { %s823_s15 = sshll.u32 %s816_s28, 4  ;;  %s5858_s20 = scalar_lea.sflag [#allocation16], %s4837_s16  ;;  %s824_s15 = int_to_ptr.vmem [resolvable:$true] %s823_s15 }
  0xf8   : > { %s4930_s18 = scalar_lea.hbm %s5939_s7, %s4870_s4  ;;  %s3815_s30 = scalar_lea.hbm %s5939_s7, 32 }
  0xf9   : > { %s3811_s27 = scalar_lea.hbm %s4930_s18, 16  ;;  %p3816_p1 = scmp.lt.u32.totalorder %s4930_s18, %s5939_s7 }
  0xfa   : > { %p3812_p10 = scmp.ne.s32.totalorder %s4930_s18, %s3811_s27  ;;  %p3817_p2 = scmp.lt.u32.totalorder %s3815_s30, %s3811_s27 }
  0xfb   : > { %p3819_p3 = scmp.lt.u32.totalorder %s3811_s27, %s4930_s18 }
  0xfc   : > { %p3813_p11 = pnand %p3812_p10, %p5935_p13  ;;  %p3818_p7 = por %p3817_p2, %p3816_p1 }
  0xfe   : > { %p3814_p0 = pneg %p3813_p11  ;;  %p3820_p12 = por %p3819_p3, %p3818_p7 }
 0x100   : > { %p3821_p4 = pnand %p3820_p12, %p3814_p0 }
 0x102   : > { %3824 = shalt.err (!%p3821_p4)
}
 0x103   : > { %s3825_s10 = scalar_lea.vmem %s824_s15, 16  ;;  %s4464_s28 = smov [#allocation15]  }
 0x104   : > { %p3826_p8 = scmp.ne.s32.totalorder %s824_s15, %s3825_s10  ;;  %s3829_s26 = sshll.u32 %s4464_s28, 4  ;;  %s3830_s26 = int_to_ptr.vmem [resolvable:$false] %s3829_s26 }
 0x105   : > { %s3831_s8 = scalar_lea.vmem %s3830_s26, 32  ;;  %p3832_p9 = scmp.lt.s32.totalorder %s824_s15, %s3830_s26 }
 0x106   : > { %p3827_p5 = pnand %p3826_p8, %p5935_p13  ;;  %p3833_p10 = scmp.lt.s32.totalorder %s3831_s8, %s3825_s10 }
 0x108   : > { %p3828_p6 = pneg %p3827_p5  ;;  %p3834_p11 = por %p3833_p10, %p3832_p9 }
 0x10a   : > { %p3835_p1 = pnand %p3834_p11, %p3828_p6 }
 0x10c   : > { %3838 = shalt.err (!%p3835_p1)
}
 0x10d   : > { %3460 = dma.hbm_to_vmem [thread:$0]  (%p5935_p13), %s4930_s18, 16, %s824_s15, %s5858_s20  }
 0x10e   : > { %s5940_s9 = sld [smem:[#allocation83_spill]]  ;;  %s854_s26 = scalar_lea.vmem [#allocation18], %s4867_s19 }
 0x10f   : > { %s861_s1 = sshll.u32 %s854_s26, 4  ;;  %s5859_s14 = scalar_lea.sflag [#allocation19], %s4837_s16  ;;  %s862_s1 = int_to_ptr.vmem [resolvable:$true] %s861_s1 }
 0x114   : > { %s4957_s30 = scalar_lea.hbm %s5940_s9, %s4870_s4  ;;  %s3843_s15 = scalar_lea.hbm %s5940_s9, 32 }
 0x115   : > { %s3839_s10 = scalar_lea.hbm %s4957_s30, 16  ;;  %p3844_p3 = scmp.lt.u32.totalorder %s4957_s30, %s5940_s9 }
 0x116   : > { %p3840_p0 = scmp.ne.s32.totalorder %s4957_s30, %s3839_s10  ;;  %p3845_p12 = scmp.lt.u32.totalorder %s3843_s15, %s3839_s10 }
 0x117   : > { %p3847_p8 = scmp.lt.u32.totalorder %s3839_s10, %s4957_s30 }
 0x118   : > { %p3841_p2 = pnand %p3840_p0, %p5935_p13  ;;  %p3846_p4 = por %p3845_p12, %p3844_p3 }
 0x11a   : > { %p3842_p7 = pneg %p3841_p2  ;;  %p3848_p5 = por %p3847_p8, %p3846_p4 }
 0x11c   : > { %p3849_p6 = pnand %p3848_p5, %p3842_p7 }
 0x11e   : > { %3852 = shalt.err (!%p3849_p6)
}
 0x11f   : > { %s3853_s29 = scalar_lea.vmem %s862_s1, 16  ;;  %s4465_s26 = smov [#allocation18]  }
 0x120   : > { %p3854_p9 = scmp.ne.s32.totalorder %s862_s1, %s3853_s29  ;;  %s3857_s20 = sshll.u32 %s4465_s26, 4  ;;  %s3858_s20 = int_to_ptr.vmem [resolvable:$false] %s3857_s20 }
 0x121   : > { %s3859_s28 = scalar_lea.vmem %s3858_s20, 32  ;;  %p3860_p1 = scmp.lt.s32.totalorder %s862_s1, %s3858_s20 }
 0x122   : > { %p3855_p10 = pnand %p3854_p9, %p5935_p13  ;;  %p3861_p0 = scmp.lt.s32.totalorder %s3859_s28, %s3853_s29 }
 0x124   : > { %p3856_p11 = pneg %p3855_p10  ;;  %p3862_p2 = por %p3861_p0, %p3860_p1 }
 0x126   : > { %p3863_p3 = pnand %p3862_p2, %p3856_p11 }
 0x128   : > { %3866 = shalt.err (!%p3863_p3)
}
 0x129   : > { %3462 = dma.hbm_to_vmem [thread:$0]  (%p5935_p13), %s4957_s30, 16, %s862_s1, %s5859_s14  }
 0x12a   : > { %s5941_s11 = sld [smem:[#allocation85_spill]]  ;;  %s892_s20 = scalar_lea.vmem [#allocation21], %s4867_s19 }
 0x12b   : > { %s899_s8 = sshll.u32 %s892_s20, 4  ;;  %s5860_s27 = scalar_lea.sflag [#allocation22], %s4837_s16  ;;  %s900_s8 = int_to_ptr.vmem [resolvable:$true] %s899_s8 }
 0x130   : > { %s4984_s15 = scalar_lea.hbm %s5941_s11, %s4870_s4  ;;  %s3871_s1 = scalar_lea.hbm %s5941_s11, 32 }
 0x131   : > { %s3867_s29 = scalar_lea.hbm %s4984_s15, 16  ;;  %p3872_p8 = scmp.lt.u32.totalorder %s4984_s15, %s5941_s11 }
 0x132   : > { %p3868_p7 = scmp.ne.s32.totalorder %s4984_s15, %s3867_s29  ;;  %p3873_p5 = scmp.lt.u32.totalorder %s3871_s1, %s3867_s29 }
 0x133   : > { %p3875_p9 = scmp.lt.u32.totalorder %s3867_s29, %s4984_s15 }
 0x134   : > { %p3869_p12 = pnand %p3868_p7, %p5935_p13  ;;  %p3874_p6 = por %p3873_p5, %p3872_p8 }
 0x136   : > { %p3870_p4 = pneg %p3869_p12  ;;  %p3876_p10 = por %p3875_p9, %p3874_p6 }
 0x138   : > { %p3877_p11 = pnand %p3876_p10, %p3870_p4 }
 0x13a   : > { %3880 = shalt.err (!%p3877_p11)
}
 0x13b   : > { %s3881_s18 = scalar_lea.vmem %s900_s8, 16  ;;  %s4466_s20 = smov [#allocation21]  }
 0x13c   : > { %p3882_p1 = scmp.ne.s32.totalorder %s900_s8, %s3881_s18  ;;  %s3885_s14 = sshll.u32 %s4466_s20, 4  ;;  %s3886_s14 = int_to_ptr.vmem [resolvable:$false] %s3885_s14 }
 0x13d   : > { %s3887_s26 = scalar_lea.vmem %s3886_s14, 32  ;;  %p3888_p3 = scmp.lt.s32.totalorder %s900_s8, %s3886_s14 }
 0x13e   : > { %p3883_p0 = pnand %p3882_p1, %p5935_p13  ;;  %p3889_p7 = scmp.lt.s32.totalorder %s3887_s26, %s3881_s18 }
 0x140   : > { %p3884_p2 = pneg %p3883_p0  ;;  %p3890_p12 = por %p3889_p7, %p3888_p3 }
 0x142   : > { %p3891_p5 = pnand %p3890_p12, %p3884_p2 }
 0x144   : > { %3894 = shalt.err (!%p3891_p5)
}
 0x145   : > { %3464 = dma.hbm_to_vmem [thread:$0]  (%p5935_p13), %s4984_s15, 16, %s900_s8, %s5860_s27  }
 0x146   : > { %s5942_s13 = sld [smem:[#allocation87_spill]]  ;;  %s926_s14 = scalar_lea.vmem [#allocation24], %s4867_s19 }
 0x147   : > { %s933_s28 = sshll.u32 %s926_s14, 4  ;;  %s5861_s10 = scalar_lea.sflag [#allocation25], %s4837_s16  ;;  %s934_s28 = int_to_ptr.vmem [resolvable:$true] %s933_s28 }
 0x14c   : > { %s5011_s1 = scalar_lea.hbm %s5942_s13, %s4870_s4  ;;  %s3899_s8 = scalar_lea.hbm %s5942_s13, 32 }
 0x14d   : > { %s3895_s18 = scalar_lea.hbm %s5011_s1, 16  ;;  %p3900_p9 = scmp.lt.u32.totalorder %s5011_s1, %s5942_s13 }
 0x14e   : > { %p3896_p4 = scmp.ne.s32.totalorder %s5011_s1, %s3895_s18  ;;  %p3901_p10 = scmp.lt.u32.totalorder %s3899_s8, %s3895_s18 }
 0x14f   : > { %p3903_p1 = scmp.lt.u32.totalorder %s3895_s18, %s5011_s1 }
 0x150   : > { %p3897_p8 = pnand %p3896_p4, %p5935_p13  ;;  %p3902_p11 = por %p3901_p10, %p3900_p9 }
 0x152   : > { %p3898_p6 = pneg %p3897_p8  ;;  %p3904_p0 = por %p3903_p1, %p3902_p11 }
 0x154   : > { %p3905_p2 = pnand %p3904_p0, %p3898_p6 }
 0x156   : > { %3908 = shalt.err (!%p3905_p2)
}
 0x157   : > { %s3909_s30 = scalar_lea.vmem %s934_s28, 16  ;;  %s4467_s14 = smov [#allocation24]  }
 0x158   : > { %p3910_p3 = scmp.ne.s32.totalorder %s934_s28, %s3909_s30  ;;  %s3913_s27 = sshll.u32 %s4467_s14, 4  ;;  %s3914_s27 = int_to_ptr.vmem [resolvable:$false] %s3913_s27 }
 0x159   : > { %s3915_s20 = scalar_lea.vmem %s3914_s27, 32  ;;  %p3916_p5 = scmp.lt.s32.totalorder %s934_s28, %s3914_s27 }
 0x15a   : > { %p3911_p7 = pnand %p3910_p3, %p5935_p13  ;;  %p3917_p4 = scmp.lt.s32.totalorder %s3915_s20, %s3909_s30 }
 0x15c   : > { %p3912_p12 = pneg %p3911_p7  ;;  %p3918_p8 = por %p3917_p4, %p3916_p5 }
 0x15e   : > { %p3919_p9 = pnand %p3918_p8, %p3912_p12 }
 0x160   : > { %3922 = shalt.err (!%p3919_p9)
}
 0x161   : > { %3466 = dma.hbm_to_vmem [thread:$0]  (%p5935_p13), %s5011_s1, 16, %s934_s28, %s5861_s10  }
 0x162   : > { %s5943_s8 = sld [smem:[#allocation89_spill]]  ;;  %s964_s27 = scalar_lea.vmem [#allocation27], %s4867_s19 }
 0x163   : > { %s971_s29 = sshll.u32 %s964_s27, 4  ;;  %s972_s29 = int_to_ptr.vmem [resolvable:$true] %s971_s29 }
 0x168   : > { %s5038_s26 = scalar_lea.hbm %s5943_s8, %s4870_s4  ;;  %s3927_s28 = scalar_lea.hbm %s5943_s8, 32 }
 0x169   : > { %s3923_s14 = scalar_lea.hbm %s5038_s26, 16  ;;  %p3928_p1 = scmp.lt.u32.totalorder %s5038_s26, %s5943_s8 }
 0x16a   : > { %p3924_p6 = scmp.ne.s32.totalorder %s5038_s26, %s3923_s14  ;;  %p3929_p0 = scmp.lt.u32.totalorder %s3927_s28, %s3923_s14 }
 0x16b   : > { %p3931_p3 = scmp.lt.u32.totalorder %s3923_s14, %s5038_s26 }
 0x16c   : > { %p3925_p10 = pnand %p3924_p6, %p5935_p13  ;;  %p3930_p2 = por %p3929_p0, %p3928_p1 }
 0x16e   : > { %p3926_p11 = pneg %p3925_p10  ;;  %p3932_p7 = por %p3931_p3, %p3930_p2 }
 0x170   : > { %p3933_p12 = pnand %p3932_p7, %p3926_p11 }
 0x172   : > { %3936 = shalt.err (!%p3933_p12)
}
 0x173   : > { %s3937_s27 = scalar_lea.vmem %s972_s29, 16  ;;  %s4468_s10 = smov [#allocation27]  }
 0x174   : > { %p3938_p5 = scmp.ne.s32.totalorder %s972_s29, %s3937_s27  ;;  %s3941_s30 = sshll.u32 %s4468_s10, 4  ;;  %s3942_s30 = int_to_ptr.vmem [resolvable:$false] %s3941_s30 }
 0x175   : > { %s3943_s20 = scalar_lea.vmem %s3942_s30, 32  ;;  %p3944_p9 = scmp.lt.s32.totalorder %s972_s29, %s3942_s30 }
 0x176   : > { %p3939_p4 = pnand %p3938_p5, %p5935_p13  ;;  %p3945_p6 = scmp.lt.s32.totalorder %s3943_s20, %s3937_s27 }
 0x178   : > { %p3940_p8 = pneg %p3939_p4  ;;  %p3946_p10 = por %p3945_p6, %p3944_p9 }
 0x17a   : > { %p3947_p0 = pnand %p3946_p10, %p3940_p8 }
 0x17c   : > { %3950 = shalt.err (!%p3947_p0)
}
 0x17d   : > { %s5944_s14 = scalar_lea.sflag [#allocation28], %s4837_s16  ;;  %s3151_s1 = sshll.u32 %s4834_s2, 3 }
 0x17e   : > { %3468 = dma.hbm_to_vmem [thread:$0]  (%p5935_p13), %s5038_s26, 16, %s972_s29, %s5944_s14  }
 0x17f   : > { %s3152_s10 = sshll.u32 %s4453_s23, 7  ;;  %s5945_s30 = sld [smem:[#allocation74_spill]] }
 0x180   : > { %s689_s20 = scalar_lea.vmem [#allocation3], %s3151_s1  ;;  %s5947_s11 = sld [smem:[#allocation76_spill]] }
 0x181   : > { %s696_s7 = sshll.u32 %s689_s20, 4  ;;  %s686_s26 = scalar_lea.sflag [#allocation4], %s4834_s2  ;;  %s5068_s7 = int_to_ptr.vmem [resolvable:$true] %s696_s7 }
 0x182   : > { %p5948_p1 = scmp.ne.s32.totalorder %s5908_s17, 0 }
 0x185   : > { %s5946_s15 = smov %s5945_s30  ;;  %s5066_s27 = scalar_lea.hbm %s5945_s30, %s3152_s10 }
 0x186   : > { %s5074_s12 = scalar_lea.hbm %s5947_s11, %s4870_s4  ;;  %s3951_s29 = scalar_lea.hbm %s5066_s27, 128 }
 0x187   : > { %p3952_p11 = scmp.ne.s32.totalorder %s5066_s27, %s3951_s29  ;;  %s3955_s28 = scalar_lea.hbm %s5946_s15, 256 }
 0x188   : > { %p3956_p7 = scmp.lt.u32.totalorder %s5066_s27, %s5946_s15  ;;  %p3957_p12 = scmp.lt.u32.totalorder %s3955_s28, %s3951_s29 }
 0x189   : > { %p3953_p2 = pnand %p3952_p11, %p5948_p1  ;;  %p3959_p4 = scmp.lt.u32.totalorder %s3951_s29, %s5066_s27 }
 0x18a   : > { %p3958_p5 = por %p3957_p12, %p3956_p7 }
 0x18b   : > { %p3954_p3 = pneg %p3953_p2 }
 0x18c   : > { %p3960_p8 = por %p3959_p4, %p3958_p5 }
 0x18e   : > { %p3961_p9 = pnand %p3960_p8, %p3954_p3 }
 0x190   : > { %3964 = shalt.err (!%p3961_p9)
}
 0x191   : > { %s3965_s9 = scalar_lea.vmem %s5068_s7, 128  ;;  %s4469_s2 = smov [#allocation3]  }
 0x192   : > { %p3966_p6 = scmp.ne.s32.totalorder %s5068_s7, %s3965_s9  ;;  %s3969_s8 = sshll.u32 %s4469_s2, 4  ;;  %s3970_s8 = int_to_ptr.vmem [resolvable:$false] %s3969_s8 }
 0x193   : > { %s3971_s30 = scalar_lea.vmem %s3970_s8, 256  ;;  %p3972_p11 = scmp.lt.s32.totalorder %s5068_s7, %s3970_s8 }
 0x194   : > { %p3967_p10 = pnand %p3966_p6, %p5948_p1  ;;  %p3973_p2 = scmp.lt.s32.totalorder %s3971_s30, %s3965_s9 }
 0x196   : > { %p3968_p0 = pneg %p3967_p10  ;;  %p3974_p7 = por %p3973_p2, %p3972_p11 }
 0x198   : > { %p3975_p12 = pnand %p3974_p7, %p3968_p0 }
 0x19a   : > { %3978 = shalt.err (!%p3975_p12)
}
 0x19b   : > { %3453 = dma.hbm_to_vmem [thread:$0]  (%p5948_p1), %s5066_s27, 128, %s5068_s7, %s686_s26  }
 0x19c   : > { %s723_s20 = scalar_lea.vmem [#allocation8], %s4867_s19  ;;  %s5100_s14 = sshll.u32 %s4867_s19, 5 }
 0x19d   : > { %s730_s29 = sshll.u32 %s723_s20, 4  ;;  %s3979_s10 = scalar_lea.hbm %s5074_s12, 16  ;;  %s731_s29 = int_to_ptr.vmem [resolvable:$true] %s730_s29 }
 0x19e   : > { %p3980_p3 = scmp.ne.s32.totalorder %s5074_s12, %s3979_s10  ;;  %s3983_s18 = scalar_lea.hbm %s5947_s11, 32 }
 0x19f   : > { %p3984_p8 = scmp.lt.u32.totalorder %s5074_s12, %s5947_s11  ;;  %p3985_p9 = scmp.lt.u32.totalorder %s3983_s18, %s3979_s10 }
 0x1a0   : > { %p3981_p5 = pnand %p3980_p3, %p5935_p13  ;;  %p3987_p6 = scmp.lt.u32.totalorder %s3979_s10, %s5074_s12 }
 0x1a1   : > { %p3986_p1 = por %p3985_p9, %p3984_p8 }
 0x1a2   : > { %p3982_p4 = pneg %p3981_p5 }
 0x1a3   : > { %p3988_p10 = por %p3987_p6, %p3986_p1 }
 0x1a5   : > { %p3989_p0 = pnand %p3988_p10, %p3982_p4 }
 0x1a7   : > { %3992 = shalt.err (!%p3989_p0)
}
 0x1a8   : > { %s3993_s7 = scalar_lea.vmem %s731_s29, 16  ;;  %s4470_s27 = smov [#allocation8]  }
 0x1a9   : > { %p3994_p11 = scmp.ne.s32.totalorder %s731_s29, %s3993_s7  ;;  %s3997_s26 = sshll.u32 %s4470_s27, 4  ;;  %s3998_s26 = int_to_ptr.vmem [resolvable:$false] %s3997_s26 }
 0x1aa   : > { %s3999_s2 = scalar_lea.vmem %s3998_s26, 32  ;;  %p4000_p12 = scmp.lt.s32.totalorder %s731_s29, %s3998_s26 }
 0x1ab   : > { %p3995_p2 = pnand %p3994_p11, %p5935_p13  ;;  %p4001_p3 = scmp.lt.s32.totalorder %s3999_s2, %s3993_s7 }
 0x1ad   : > { %p3996_p7 = pneg %p3995_p2  ;;  %p4002_p5 = por %p4001_p3, %p4000_p12 }
 0x1af   : > { %p4003_p8 = pnand %p4002_p5, %p3996_p7 }
 0x1b1   : > { %4006 = shalt.err (!%p4003_p8)
}
 0x1b2   : > { %s5949_s8 = scalar_lea.sflag [#allocation7], %s4837_s16  ;;  %s5122_s30 = sshll.u32 %s4449_s22, 9 }
 0x1b3   : > { %3455 = dma.hbm_to_vmem [thread:$0]  (%p5935_p13), %s5074_s12, 16, %s731_s29, %s5949_s8  }
 0x1b4   : > { %s758_s20 = scalar_lea.vmem [#allocation11], %s5100_s14  ;;  %s5950_s18 = sld [smem:[#allocation78_spill]] }
 0x1b5   : > { %s765_s10 = sshll.u32 %s758_s20, 4  ;;  %s5131_s10 = int_to_ptr.vmem [resolvable:$true] %s765_s10 }
 0x1ba   : > { %s5129_s1 = scalar_lea.hbm %s5950_s18, %s5122_s30  ;;  %s4011_s7 = scalar_lea.hbm %s5950_s18, 1024 }
 0x1bb   : > { %s4007_s9 = scalar_lea.hbm %s5129_s1, 512  ;;  %p4012_p6 = scmp.lt.u32.totalorder %s5129_s1, %s5950_s18 }
 0x1bc   : > { %p4008_p4 = scmp.ne.s32.totalorder %s5129_s1, %s4007_s9  ;;  %p4013_p10 = scmp.lt.u32.totalorder %s4011_s7, %s4007_s9 }
 0x1bd   : > { %p4015_p11 = scmp.lt.u32.totalorder %s4007_s9, %s5129_s1 }
 0x1be   : > { %p4009_p9 = pnand %p4008_p4, %p5935_p13  ;;  %p4014_p0 = por %p4013_p10, %p4012_p6 }
 0x1c0   : > { %p4010_p1 = pneg %p4009_p9  ;;  %p4016_p2 = por %p4015_p11, %p4014_p0 }
 0x1c2   : > { %p4017_p7 = pnand %p4016_p2, %p4010_p1 }
 0x1c4   : > { %4020 = shalt.err (!%p4017_p7)
}
 0x1c5   : > { %s4021_s2 = scalar_lea.vmem %s5131_s10, 512  ;;  %s4471_s8 = smov [#allocation11]  }
 0x1c6   : > { %p4022_p12 = scmp.ne.s32.totalorder %s5131_s10, %s4021_s2  ;;  %s4025_s20 = sshll.u32 %s4471_s8, 4  ;;  %s4026_s20 = int_to_ptr.vmem [resolvable:$false] %s4025_s20 }
 0x1c7   : > { %s4027_s17 = scalar_lea.vmem %s4026_s20, 1024  ;;  %p4028_p8 = scmp.lt.s32.totalorder %s5131_s10, %s4026_s20 }
 0x1c8   : > { %p4023_p3 = pnand %p4022_p12, %p5935_p13  ;;  %p4029_p4 = scmp.lt.s32.totalorder %s4027_s17, %s4021_s2 }
 0x1ca   : > { %p4024_p5 = pneg %p4023_p3  ;;  %p4030_p9 = por %p4029_p4, %p4028_p8 }
 0x1cc   : > { %p4031_p6 = pnand %p4030_p9, %p4024_p5 }
 0x1ce   : > { %4034 = shalt.err (!%p4031_p6)
}
 0x1cf   : > { %s4472_s28 = smov 128   ;;  %s4473_s9 = smov 8  }
 0x1d0   : > { %s5951_s12 = scalar_lea.sflag [#allocation10], %s4837_s16  ;;  %s5952_s27 = sld [smem:[#allocation80_spill]] }
 0x1d1   : > { %3457 = dma.hbm_to_vmem [thread:$0]  (%p5935_p13), %s5129_s1, 512, %s5131_s10, %s5951_s12, %s4472_s28, %s4472_s28, %s4473_s9  }
 0x1d2   : > { %s796_s2 = scalar_lea.vmem [#allocation14], %s5100_s14  ;;  %s5954_s13 = sld [smem:[#allocation82_spill]] }
 0x1d3   : > { %s803_s20 = sshll.u32 %s796_s2, 4  ;;  %s5166_s20 = int_to_ptr.vmem [resolvable:$true] %s803_s20 }
 0x1d6   : > { %s5953_s8 = smov %s5952_s27  ;;  %s5163_s26 = scalar_lea.hbm %s5952_s27, %s5122_s30 }
 0x1d7   : > { %s4035_s18 = scalar_lea.hbm %s5163_s26, 512  ;;  %s4039_s12 = scalar_lea.hbm %s5953_s8, 1024 }
 0x1d8   : > { %s5172_s15 = scalar_lea.hbm %s5954_s13, %s5122_s30  ;;  %p4036_p1 = scmp.ne.s32.totalorder %s5163_s26, %s4035_s18 }
 0x1d9   : > { %p4040_p11 = scmp.lt.u32.totalorder %s5163_s26, %s5953_s8  ;;  %p4041_p2 = scmp.lt.u32.totalorder %s4039_s12, %s4035_s18 }
 0x1da   : > { %p4037_p10 = pnand %p4036_p1, %p5935_p13  ;;  %p4043_p12 = scmp.lt.u32.totalorder %s4035_s18, %s5163_s26 }
 0x1db   : > { %p4042_p7 = por %p4041_p2, %p4040_p11 }
 0x1dc   : > { %p4038_p0 = pneg %p4037_p10 }
 0x1dd   : > { %p4044_p3 = por %p4043_p12, %p4042_p7 }
 0x1df   : > { %p4045_p5 = pnand %p4044_p3, %p4038_p0 }
 0x1e1   : > { %4048 = shalt.err (!%p4045_p5)
}
 0x1e2   : > { %s4049_s11 = scalar_lea.vmem %s5166_s20, 512  ;;  %s4474_s27 = smov [#allocation14]  }
 0x1e3   : > { %p4050_p8 = scmp.ne.s32.totalorder %s5166_s20, %s4049_s11  ;;  %s4053_s2 = sshll.u32 %s4474_s27, 4  ;;  %s4054_s2 = int_to_ptr.vmem [resolvable:$false] %s4053_s2 }
 0x1e4   : > { %s4055_s17 = scalar_lea.vmem %s4054_s2, 1024  ;;  %p4056_p6 = scmp.lt.s32.totalorder %s5166_s20, %s4054_s2 }
 0x1e5   : > { %p4051_p4 = pnand %p4050_p8, %p5935_p13  ;;  %p4057_p1 = scmp.lt.s32.totalorder %s4055_s17, %s4049_s11 }
 0x1e7   : > { %p4052_p9 = pneg %p4051_p4  ;;  %p4058_p10 = por %p4057_p1, %p4056_p6 }
 0x1e9   : > { %p4059_p11 = pnand %p4058_p10, %p4052_p9 }
 0x1eb   : > { %4062 = shalt.err (!%p4059_p11)
}
 0x1ec   : > { %s5955_s18 = scalar_lea.sflag [#allocation13], %s4837_s16  ;;  %s834_s10 = scalar_lea.vmem [#allocation17], %s5100_s14 }
 0x1ed   : > { %3459 = dma.hbm_to_vmem [thread:$0]  (%p5935_p13), %s5163_s26, 512, %s5166_s20, %s5955_s18, %s4472_s28, %s4472_s28, %s4473_s9  }
 0x1ee   : > { %s841_s1 = sshll.u32 %s834_s10, 4  ;;  %s5956_s7 = sld [smem:[#allocation84_spill]]  ;;  %s5201_s1 = int_to_ptr.vmem [resolvable:$true] %s841_s1 }
 0x1ef   : > { %s4063_s27 = scalar_lea.hbm %s5172_s15, 512  ;;  %s4067_s8 = scalar_lea.hbm %s5954_s13, 1024 }
 0x1f0   : > { %p4064_p0 = scmp.ne.s32.totalorder %s5172_s15, %s4063_s27  ;;  %p4068_p12 = scmp.lt.u32.totalorder %s5172_s15, %s5954_s13 }
 0x1f1   : > { %p4069_p3 = scmp.lt.u32.totalorder %s4067_s8, %s4063_s27  ;;  %p4071_p8 = scmp.lt.u32.totalorder %s4063_s27, %s5172_s15 }
 0x1f2   : > { %p4065_p2 = pnand %p4064_p0, %p5935_p13 }
 0x1f3   : > { %p4070_p5 = por %p4069_p3, %p4068_p12 }
 0x1f4   : > { %s5207_s11 = scalar_lea.hbm %s5956_s7, %s5122_s30  ;;  %p4066_p7 = pneg %p4065_p2 }
 0x1f5   : > { %p4072_p4 = por %p4071_p8, %p4070_p5 }
 0x1f7   : > { %p4073_p9 = pnand %p4072_p4, %p4066_p7 }
 0x1f9   : > { %4076 = shalt.err (!%p4073_p9)
}
 0x1fa   : > { %s4077_s20 = scalar_lea.vmem %s5201_s1, 512  ;;  %s4475_s18 = smov [#allocation17]  }
 0x1fb   : > { %p4078_p6 = scmp.ne.s32.totalorder %s5201_s1, %s4077_s20  ;;  %s4081_s10 = sshll.u32 %s4475_s18, 4  ;;  %s4082_s10 = int_to_ptr.vmem [resolvable:$false] %s4081_s10 }
 0x1fc   : > { %s4083_s23 = scalar_lea.vmem %s4082_s10, 1024  ;;  %p4084_p11 = scmp.lt.s32.totalorder %s5201_s1, %s4082_s10 }
 0x1fd   : > { %p4079_p1 = pnand %p4078_p6, %p5935_p13  ;;  %p4085_p0 = scmp.lt.s32.totalorder %s4083_s23, %s4077_s20 }
 0x1ff   : > { %p4080_p10 = pneg %p4079_p1  ;;  %p4086_p2 = por %p4085_p0, %p4084_p11 }
 0x201   : > { %p4087_p12 = pnand %p4086_p2, %p4080_p10 }
 0x203   : > { %4090 = shalt.err (!%p4087_p12)
}
 0x204   : > { %s5957_s8 = scalar_lea.sflag [#allocation16], %s4837_s16  ;;  %s872_s12 = scalar_lea.vmem [#allocation20], %s5100_s14 }
 0x205   : > { %3461 = dma.hbm_to_vmem [thread:$0]  (%p5935_p13), %s5172_s15, 512, %s5201_s1, %s5957_s8, %s4472_s28, %s4472_s28, %s4473_s9  }
 0x206   : > { %s879_s29 = sshll.u32 %s872_s12, 4  ;;  %s5958_s17 = sld [smem:[#allocation86_spill]]  ;;  %s5236_s29 = int_to_ptr.vmem [resolvable:$true] %s879_s29 }
 0x207   : > { %s4091_s20 = scalar_lea.hbm %s5207_s11, 512  ;;  %s4095_s23 = scalar_lea.hbm %s5956_s7, 1024 }
 0x208   : > { %p4092_p7 = scmp.ne.s32.totalorder %s5207_s11, %s4091_s20  ;;  %p4096_p8 = scmp.lt.u32.totalorder %s5207_s11, %s5956_s7 }
 0x209   : > { %p4097_p4 = scmp.lt.u32.totalorder %s4095_s23, %s4091_s20  ;;  %p4099_p6 = scmp.lt.u32.totalorder %s4091_s20, %s5207_s11 }
 0x20a   : > { %p4093_p3 = pnand %p4092_p7, %p5935_p13 }
 0x20b   : > { %p4098_p9 = por %p4097_p4, %p4096_p8 }
 0x20c   : > { %s5242_s26 = scalar_lea.hbm %s5958_s17, %s4870_s4  ;;  %p4094_p5 = pneg %p4093_p3 }
 0x20d   : > { %p4100_p1 = por %p4099_p6, %p4098_p9 }
 0x20f   : > { %p4101_p10 = pnand %p4100_p1, %p4094_p5 }
 0x211   : > { %4104 = shalt.err (!%p4101_p10)
}
 0x212   : > { %s4105_s1 = scalar_lea.vmem %s5236_s29, 512  ;;  %s4476_s8 = smov [#allocation20]  }
 0x213   : > { %p4106_p11 = scmp.ne.s32.totalorder %s5236_s29, %s4105_s1  ;;  %s4109_s12 = sshll.u32 %s4476_s8, 4  ;;  %s4110_s12 = int_to_ptr.vmem [resolvable:$false] %s4109_s12 }
 0x214   : > { %s4111_s13 = scalar_lea.vmem %s4110_s12, 1024  ;;  %p4112_p12 = scmp.lt.s32.totalorder %s5236_s29, %s4110_s12 }
 0x215   : > { %p4107_p0 = pnand %p4106_p11, %p5935_p13  ;;  %p4113_p7 = scmp.lt.s32.totalorder %s4111_s13, %s4105_s1 }
 0x217   : > { %p4108_p2 = pneg %p4107_p0  ;;  %p4114_p3 = por %p4113_p7, %p4112_p12 }
 0x219   : > { %p4115_p8 = pnand %p4114_p3, %p4108_p2 }
 0x21b   : > { %4118 = shalt.err (!%p4115_p8)
}
 0x21c   : > { %s5959_s27 = scalar_lea.sflag [#allocation19], %s4837_s16  ;;  %s909_s2 = scalar_lea.vmem [#allocation23], %s4867_s19 }
 0x21d   : > { %3463 = dma.hbm_to_vmem [thread:$0]  (%p5935_p13), %s5207_s11, 512, %s5236_s29, %s5959_s27, %s4472_s28, %s4472_s28, %s4473_s9  }
 0x21e   : > { %s916_s20 = sshll.u32 %s909_s2, 4  ;;  %s5960_s23 = sld [smem:[#allocation88_spill]]  ;;  %s917_s20 = int_to_ptr.vmem [resolvable:$true] %s916_s20 }
 0x21f   : > { %s4119_s8 = scalar_lea.hbm %s5242_s26, 16  ;;  %s4123_s7 = scalar_lea.hbm %s5958_s17, 32 }
 0x220   : > { %p4120_p5 = scmp.ne.s32.totalorder %s5242_s26, %s4119_s8  ;;  %p4124_p6 = scmp.lt.u32.totalorder %s5242_s26, %s5958_s17 }
 0x221   : > { %p4125_p1 = scmp.lt.u32.totalorder %s4123_s7, %s4119_s8  ;;  %p4127_p11 = scmp.lt.u32.totalorder %s4119_s8, %s5242_s26 }
 0x222   : > { %p4121_p4 = pnand %p4120_p5, %p5935_p13 }
 0x223   : > { %p4126_p10 = por %p4125_p1, %p4124_p6 }
 0x224   : > { %s5961_s15 = smov %s5960_s23  ;;  %s5275_s1 = scalar_lea.hbm %s5960_s23, %s5122_s30 }
 0x225   : > { %p4122_p9 = pneg %p4121_p4  ;;  %p4128_p0 = por %p4127_p11, %p4126_p10 }
 0x227   : > { %p4129_p2 = pnand %p4128_p0, %p4122_p9 }
 0x229   : > { %4132 = shalt.err (!%p4129_p2)
}
 0x22a   : > { %s4133_s30 = scalar_lea.vmem %s917_s20, 16  ;;  %s4477_s11 = smov [#allocation23]  }
 0x22b   : > { %p4134_p12 = scmp.ne.s32.totalorder %s917_s20, %s4133_s30  ;;  %s4137_s29 = sshll.u32 %s4477_s11, 4  ;;  %s4138_s29 = int_to_ptr.vmem [resolvable:$false] %s4137_s29 }
 0x22c   : > { %s4139_s27 = scalar_lea.vmem %s4138_s29, 32  ;;  %p4140_p8 = scmp.lt.s32.totalorder %s917_s20, %s4138_s29 }
 0x22d   : > { %p4135_p7 = pnand %p4134_p12, %p5935_p13  ;;  %p4141_p5 = scmp.lt.s32.totalorder %s4139_s27, %s4133_s30 }
 0x22f   : > { %p4136_p3 = pneg %p4135_p7  ;;  %p4142_p4 = por %p4141_p5, %p4140_p8 }
 0x231   : > { %p4143_p1 = pnand %p4142_p4, %p4136_p3 }
 0x233   : > { %4146 = shalt.err (!%p4143_p1)
}
 0x234   : > { %s5962_s25 = scalar_lea.sflag [#allocation22], %s4837_s16  ;;  %s944_s5 = scalar_lea.vmem [#allocation26], %s5100_s14 }
 0x235   : > { %3465 = dma.hbm_to_vmem [thread:$0]  (%p5935_p13), %s5242_s26, 16, %s917_s20, %s5962_s25  }
 0x236   : > { %s951_s7 = sshll.u32 %s944_s5, 4  ;;  %s3178_s2 = sshll.u32 %s4867_s19, 6  ;;  %s5298_s7 = int_to_ptr.vmem [resolvable:$true] %s951_s7 }
 0x237   : > { %s4147_s18 = scalar_lea.hbm %s5275_s1, 512  ;;  %s4151_s8 = scalar_lea.hbm %s5961_s15, 1024 }
 0x238   : > { %p4148_p9 = scmp.ne.s32.totalorder %s5275_s1, %s4147_s18  ;;  %p4152_p11 = scmp.lt.u32.totalorder %s5275_s1, %s5961_s15 }
 0x239   : > { %p4153_p0 = scmp.lt.u32.totalorder %s4151_s8, %s4147_s18  ;;  %p4155_p12 = scmp.lt.u32.totalorder %s4147_s18, %s5275_s1 }
 0x23a   : > { %p4149_p6 = pnand %p4148_p9, %p5935_p13 }
 0x23b   : > { %p4154_p2 = por %p4153_p0, %p4152_p11 }
 0x23c   : > { %p4150_p10 = pneg %p4149_p6 }
 0x23d   : > { %p4156_p7 = por %p4155_p12, %p4154_p2 }
 0x23f   : > { %p4157_p3 = pnand %p4156_p7, %p4150_p10 }
 0x241   : > { %4160 = shalt.err (!%p4157_p3)
}
 0x242   : > { %s4161_s14 = scalar_lea.vmem %s5298_s7, 512  ;;  %s4478_s26 = smov [#allocation26]  }
 0x243   : > { %p4162_p8 = scmp.ne.s32.totalorder %s5298_s7, %s4161_s14  ;;  %s4165_s20 = sshll.u32 %s4478_s26, 4  ;;  %s4166_s20 = int_to_ptr.vmem [resolvable:$false] %s4165_s20 }
 0x244   : > { %s4167_s30 = scalar_lea.vmem %s4166_s20, 1024  ;;  %p4168_p1 = scmp.lt.s32.totalorder %s5298_s7, %s4166_s20 }
 0x245   : > { %p4163_p5 = pnand %p4162_p8, %p5935_p13  ;;  %p4169_p9 = scmp.lt.s32.totalorder %s4167_s30, %s4161_s14 }
 0x247   : > { %p4164_p4 = pneg %p4163_p5  ;;  %p4170_p6 = por %p4169_p9, %p4168_p1 }
 0x249   : > { %p4171_p11 = pnand %p4170_p6, %p4164_p4 }
 0x24b   : > { %4174 = shalt.err (!%p4171_p11)
}
 0x24c   : > { %s5963_s11 = scalar_lea.sflag [#allocation25], %s4837_s16  ;;  %s3242_s29 = sshll.u32 %s4449_s22, 10 }
 0x24d   : > { %3467 = dma.hbm_to_vmem [thread:$0]  (%p5935_p13), %s5275_s1, 512, %s5298_s7, %s5963_s11, %s4472_s28, %s4472_s28, %s4473_s9  }
 0x24e   : > { %s982_s27 = scalar_lea.vmem [#allocation29], %s3178_s2  ;;  %s5964_s10 = sld [smem:[#allocation90_spill]] }
 0x24f   : > { %s989_s25 = sshll.u32 %s982_s27, 4  ;;  %s5334_s25 = int_to_ptr.vmem [resolvable:$true] %s989_s25 }
 0x254   : > { %s5332_s23 = scalar_lea.hbm %s5964_s10, %s3242_s29  ;;  %s4179_s2 = scalar_lea.hbm %s5964_s10, 2048 }
 0x255   : > { %s4175_s8 = scalar_lea.hbm %s5332_s23, 1024  ;;  %p4180_p12 = scmp.lt.u32.totalorder %s5332_s23, %s5964_s10 }
 0x256   : > { %p4176_p10 = scmp.ne.s32.totalorder %s5332_s23, %s4175_s8  ;;  %p4181_p7 = scmp.lt.u32.totalorder %s4179_s2, %s4175_s8 }
 0x257   : > { %p4183_p8 = scmp.lt.u32.totalorder %s4175_s8, %s5332_s23 }
 0x258   : > { %p4177_p0 = pnand %p4176_p10, %p5935_p13  ;;  %p4182_p3 = por %p4181_p7, %p4180_p12 }
 0x25a   : > { %p4178_p2 = pneg %p4177_p0  ;;  %p4184_p5 = por %p4183_p8, %p4182_p3 }
 0x25c   : > { %p4185_p4 = pnand %p4184_p5, %p4178_p2 }
 0x25e   : > { %4188 = shalt.err (!%p4185_p4)
}
 0x25f   : > { %s4189_s14 = scalar_lea.vmem %s5334_s25, 1024  ;;  %s4479_s26 = smov [#allocation29]  }
 0x260   : > { %p4190_p1 = scmp.ne.s32.totalorder %s5334_s25, %s4189_s14  ;;  %s4193_s20 = sshll.u32 %s4479_s26, 4  ;;  %s4194_s20 = int_to_ptr.vmem [resolvable:$false] %s4193_s20 }
 0x261   : > { %s4195_s30 = scalar_lea.vmem %s4194_s20, 2048  ;;  %p4196_p11 = scmp.lt.s32.totalorder %s5334_s25, %s4194_s20 }
 0x262   : > { %p4191_p9 = pnand %p4190_p1, %p5935_p13  ;;  %p4197_p10 = scmp.lt.s32.totalorder %s4195_s30, %s4189_s14 }
 0x264   : > { %p4192_p6 = pneg %p4191_p9  ;;  %p4198_p0 = por %p4197_p10, %p4196_p11 }
 0x266   : > { %p4199_p12 = pnand %p4198_p0, %p4192_p6 }
 0x268   : > { %4202 = shalt.err (!%p4199_p12)
}
 0x269   : > { %s5965_s11 = scalar_lea.sflag [#allocation28], %s4837_s16  ;;  %s5966_s5 = sld [smem:[#allocation91_spill]] }
 0x26a   : > { %3469 = dma.hbm_to_vmem [thread:$0]  (%p5935_p13), %s5332_s23, 1024, %s5334_s25, %s5965_s11, %s4472_s28, %s4472_s28, %s4473_s9  }
 0x26b   : > { %s1002_s1 = scalar_lea.vmem [#allocation30], %s4867_s19  ;;  %s1000_s2 = scalar_lea.sflag [#allocation31], %s4837_s16 }
 0x26c   : > { %s1009_s7 = sshll.u32 %s1002_s1, 4  ;;  %s1010_s7 = int_to_ptr.vmem [resolvable:$true] %s1009_s7 }
 0x26f   : > { %s5967_s18 = smov %s5966_s5  ;;  %s5366_s8 = scalar_lea.hbm %s5966_s5, %s4870_s4 }
 0x270   : > { %s4203_s12 = scalar_lea.hbm %s5366_s8, 16  ;;  %s4207_s9 = scalar_lea.hbm %s5967_s18, 32 }
 0x271   : > { %p4204_p2 = scmp.ne.s32.totalorder %s5366_s8, %s4203_s12  ;;  %p4208_p8 = scmp.lt.u32.totalorder %s5366_s8, %s5967_s18 }
 0x272   : > { %p4209_p5 = scmp.lt.u32.totalorder %s4207_s9, %s4203_s12  ;;  %p4211_p1 = scmp.lt.u32.totalorder %s4203_s12, %s5366_s8 }
 0x273   : > { %p4205_p7 = pnand %p4204_p2, %p5935_p13 }
 0x274   : > { %p4210_p4 = por %p4209_p5, %p4208_p8 }
 0x275   : > { %p4206_p3 = pneg %p4205_p7 }
 0x276   : > { %p4212_p9 = por %p4211_p1, %p4210_p4 }
 0x278   : > { %p4213_p6 = pnand %p4212_p9, %p4206_p3 }
 0x27a   : > { %4216 = shalt.err (!%p4213_p6)
}
 0x27b   : > { %s4217_s16 = scalar_lea.vmem %s1010_s7, 16  ;;  %s4480_s19 = smov [#allocation30]  }
 0x27c   : > { %p4218_p11 = scmp.ne.s32.totalorder %s1010_s7, %s4217_s16  ;;  %s4221_s23 = sshll.u32 %s4480_s19, 4  ;;  %s4222_s23 = int_to_ptr.vmem [resolvable:$false] %s4221_s23 }
 0x27d   : > { %s4223_s14 = scalar_lea.vmem %s4222_s23, 32  ;;  %p4224_p12 = scmp.lt.s32.totalorder %s1010_s7, %s4222_s23 }
 0x27e   : > { %p4219_p10 = pnand %p4218_p11, %p5935_p13  ;;  %p4225_p2 = scmp.lt.s32.totalorder %s4223_s14, %s4217_s16 }
 0x280   : > { %p4220_p0 = pneg %p4219_p10  ;;  %p4226_p7 = por %p4225_p2, %p4224_p12 }
 0x282   : > { %p4227_p5 = pnand %p4226_p7, %p4220_p0 }
 0x284   : > { %4230 = shalt.err (!%p4227_p5)
}
 0x285   : > { %3470 = dma.hbm_to_vmem [thread:$0]  (%p5935_p13), %s5366_s8, 16, %s1010_s7, %s1000_s2  }
 0x286 PF: > { %p5968_p3 = scmp.ne.s32.totalorder %s5926_s21, 0 }
 0x287   : > { %s5969_s26 = sld [smem:[#allocation65_spill]] (!%p5968_p3)  ;;  %s5390_s20 = sand.u32 (!%p5968_p3), 1, %s4433_s0  }
 0x288   : > { %1018 = sbr.rel (%p5968_p3) target bundleno = 3653 (0xe45), region = 100  ;;  %s3183_s30 = sshll.u32 (!%p5968_p3), %s5390_s20, 3 }
 0x289   : > { %s1021_s11 = scalar_lea.sflag (!%p5968_p3), [#allocation4], %s5390_s20  ;;  %s5396_s29 = scalar_lea.vmem (!%p5968_p3), [#allocation3], %s3183_s30 }
 0x28d   : > { %p5970_p8 = scmp.ne.s32.totalorder (!%p5968_p3), %s5969_s26, 0 }
 0x28f   : > { %4344 = dma.done.wait (%p5970_p8), %s1021_s11, 128  }
 0x290   : > { %4346 = vsyncadd (%p5970_p8), %s1021_s11, 4294967168  ;;  %s5403_s6 = sand.u32 1, %s4675_s24  }
 0x291   : > { %s1030_s21 = scalar_lea.sflag [#allocation7], %s5403_s6 }
 0x292   : > { %4348 = dma.done.wait (%p5970_p8), %s1030_s21, 16  }
 0x293   : > { %4350 = vsyncadd (%p5970_p8), %s1030_s21, 4294967280  ;;  %s5971_s5 = sld [smem:[#allocation68_spill]]  ;;  %s5412_s8 = sand.u32 1, %s4421_s3  }
 0x294   : > { %s1040_s1 = scalar_lea.vmem [#allocation8], %s5412_s8 }
 0x299   : > { %p5972_p13 = scmp.ne.s32.totalorder %s5971_s5, 0 }
 0x29b   : > { %4352 = dma.done.wait (%p5972_p13), %s1030_s21, 16  }
 0x29c   : > { %4354 = vsyncadd (%p5972_p13), %s1030_s21, 4294967280  ;;  %s1046_s7 = scalar_lea.sflag [#allocation10], %s5403_s6  ;;  %s1048_s2 = scalar_lea.vmem [#allocation9], %s5412_s8 }
 0x29d   : > { %4356 = dma.done.wait (%p5972_p13), %s1046_s7, 528  }
 0x29e   : > { %4358 = vsyncadd (%p5972_p13), %s1046_s7, 4294966768  ;;  %s3184_s12 = sshll.u32 %s5412_s8, 5  ;;  %s1063_s28 = scalar_lea.sflag [#allocation13], %s5403_s6 }
 0x29f   : > { %s5426_s13 = scalar_lea.vmem [#allocation11], %s3184_s12  ;;  %s1065_s9 = scalar_lea.vmem [#allocation12], %s5412_s8 }
 0x2a0   : > { %4360 = dma.done.wait (%p5972_p13), %s1063_s28, 528  }
 0x2a1   : > { %4362 = vsyncadd (%p5972_p13), %s1063_s28, 4294966768  ;;  %s5434_s25 = scalar_lea.vmem [#allocation14], %s3184_s12  ;;  %s1080_s4 = scalar_lea.sflag [#allocation16], %s5403_s6 }
 0x2a2   : > { %s1082_s16 = scalar_lea.vmem [#allocation15], %s5412_s8 }
 0x2a3   : > { %4364 = dma.done.wait (%p5972_p13), %s1080_s4, 528  }
 0x2a4   : > { %4366 = vsyncadd (%p5972_p13), %s1080_s4, 4294966768  ;;  %s5442_s19 = scalar_lea.vmem [#allocation17], %s3184_s12  ;;  %s1097_s23 = scalar_lea.sflag [#allocation19], %s5403_s6 }
 0x2a5   : > { %s1099_s14 = scalar_lea.vmem [#allocation18], %s5412_s8 }
 0x2a6   : > { %4368 = dma.done.wait (%p5972_p13), %s1097_s23, 528  }
 0x2a7   : > { %4370 = vsyncadd (%p5972_p13), %s1097_s23, 4294966768  ;;  %s5450_s26 = scalar_lea.vmem [#allocation20], %s3184_s12  ;;  %s1114_s11 = scalar_lea.sflag [#allocation22], %s5403_s6 }
 0x2a8   : > { %4372 = dma.done.wait (%p5972_p13), %s1114_s11, 32  }
 0x2a9   : > { %4374 = vsyncadd (%p5972_p13), %s1114_s11, 4294967264  ;;  %s1130_s28 = scalar_lea.sflag [#allocation25], %s5403_s6 }
 0x2aa   : > { %4376 = dma.done.wait (%p5972_p13), %s1130_s28, 528  }
 0x2ab   : > { %4378 = vsyncadd (%p5972_p13), %s1130_s28, 4294966768  ;;  %s5465_s23 = scalar_lea.vmem [#allocation26], %s3184_s12  ;;  %s1147_s21 = scalar_lea.sflag [#allocation28], %s5403_s6 }
 0x2ac   : > { %s1149_s27 = scalar_lea.vmem [#allocation27], %s5412_s8 }
 0x2ad   : > { %4380 = dma.done.wait (%p5972_p13), %s1147_s21, 1040  }
 0x2ae   : > { %4382 = vsyncadd (%p5972_p13), %s1147_s21, 4294966256  ;;  %s3189_s11 = sshll.u32 %s5412_s8, 6  ;;  %s1164_s28 = scalar_lea.sflag [#allocation31], %s5403_s6 }
 0x2af   : > { %s5474_s4 = scalar_lea.vmem [#allocation29], %s3189_s11  ;;  %s1166_s7 = scalar_lea.vmem [#allocation30], %s5412_s8 }
 0x2b0   : > { %4384 = dma.done.wait (%p5972_p13), %s1164_s28, 16  }
 0x2b1   : > { %4386 = vsyncadd (%p5972_p13), %s1164_s28, 4294967280  ;;  %p5973_p4 = scmp.eq.s32.totalorder %s4675_s24, 0 }
 0x2b3   : > { %4388 = dma.done.wait (%p5973_p4), [#allocation31], 16   ;;  %p5974_p1 = pmov %p5973_p4 }
 0x2b5   : > { %4390 = vsyncadd (%p5974_p1), [#allocation31], 4294967280  ;;  %p5975_p9 = pmov %p5974_p1 }
 0x2b6   : > { %p5976_p6 = pmov %p5974_p1 }
 0x2b7   : > { %4392 = dma.done.wait (%p5975_p9), [#allocation34], 16  }
 0x2b8   : > { %4394 = vsyncadd (%p5976_p6), [#allocation34], 4294967280  ;;  %s5977_s12 = sld [smem:[#allocation54_spill]]  ;;  %s5495_s5 = scalar_lea.vmem [#allocation35], %s3183_s30 }
 0x2b9   : > { %s5978_s28 = sld [smem:[#allocation59_spill]] }
 0x2be   : > { %s1309_s6 = sand.u32 1, %s5977_s12  }
 0x2bf   : > { %s3193_s21 = sshll.u32 %s1309_s6, 4  ;;  %p3194_p11 = scmp.ne.s32.totalorder %s5978_s28, 0 }
 0x2c0   : > { %s5497_s11 = scalar_lea.vmem [#allocation36], %s3193_s21  ;;  %v1316_v0 = vld [vmem:[%s5396_s29] sm:$0xff] (!%p3194_p11)  ;;  %vm1317_vm0 = vcmask (!%p3194_p11), 261120  }
 0x2c1   : > { %1315 = sbr.rel (%p3194_p11) target bundleno = 712 (0x2c8), region = 184  ;;  %1318 = vst.msk [vmem:[#allocation2] sm:$0xff] (!%p3194_p11), %vm1317_vm0, %v1316_v0 }
 0x2c8 PF: > { %v5501_v1 = vld [vmem:[#allocation2] sm:$0xff]  ;;  %vm1322_vm1 = vcmask 261120   ;;  %v4481_v11 = vmov 0.0|0.0   ;;  %v1524_v13 = vld [vmem:[%s5442_s19 + $0x8] sm:$0xff]  ;;  %v1361_v15 = vld [vmem:[%s5426_s13 + $0x18] sm:$0xff]  ;;  %vm4482_vm2 = vmmov 0   ;;  %v1608_v60 = vlaneseq }
 0x2c9   : > { %v1323_v2 = vsel %vm1322_vm1, %v5501_v1, 0.0  ;;  %v1358_v8 = vld [vmem:[%s5426_s13] sm:$0xff]  ;;  %v1359_v9 = vld [vmem:[%s5426_s13 + $0x8] sm:$0xff]  ;;  %3407 = vmatprep.subr.bf16.mxu1 %v4481_v11  ;;  %3419 = vmatprep.subr.bf16.mxu0 %v4481_v11  ;;  %v1360_v14 = vld [vmem:[%s5426_s13 + $0x10] sm:$0xff]  ;;  %v4483_v19 = vmov 0.0   ;;  %s4484_s24 = smov 120  }
 0x2ca   : > { %1324 = vadd.xlane.f32.xlu0 %v1323_v2  ;;  %v1523_v10 = vld [vmem:[%s5442_s19] sm:$0xff]  ;;  %v3408_v12 = vpack.c.bf16 %v1359_v9, %v1358_v8  ;;  %v1525_v17 = vld [vmem:[%s5442_s19 + $0x10] sm:$0xff]  ;;  %v1526_v18 = vld [vmem:[%s5442_s19 + $0x18] sm:$0xff]  ;;  %3301 = vmatprep.mubr.msk.f32.mxu1 %vm4482_vm2, %v4483_v19  ;;  %v3411_v20 = vpack.c.bf16 %v1361_v15, %v1360_v14  ;;  %vm1613_vm5 = vcmask 64512   ;;  %s4485_s30 = smov 112   ;;  %s4486_s29 = smov 104  }
 0x2cb   : > { %v3420_v16 = vpack.c.bf16 %v1524_v13, %v1523_v10  ;;  %3323 = vmatprep.mubr.msk.f32.mxu0 %vm4482_vm2, %v4483_v19  ;;  %v3423_v21 = vpack.c.bf16 %v1526_v18, %v1525_v17  ;;  %v3195_v30 = vld [vmem:[%s1040_s1] ss:$0 sm:$0xff]  ;;  %v1443_v33 = vld [vmem:[%s5434_s25 + $0x8] sm:$0xff]  ;;  %v1444_v39 = vld [vmem:[%s5434_s25 + $0x10] sm:$0xff]  ;;  %s5979_s1 = scalar_lea.vmem [#allocation6], %s5390_s20  ;;  %v1609_v62 = vshrl.u32 %v1608_v60, 7 }
 0x2cc   : > { %3409 = vmatpush3.bf16.msra.mxu1 %v3408_v12  ;;  %v1442_v32 = vld [vmem:[%s5434_s25] sm:$0xff]  ;;  %v1445_v40 = vld [vmem:[%s5434_s25 + $0x18] sm:$0xff]  ;;  %vm1702_vm7 = vcmask 60416   ;;  %s4488_s13 = smov 16   ;;  %vm2295_vm8 = vcmask 130048   ;;  %vm2297_vm9 = vcmask 195584  }
 0x2cd   : > { %3421 = vmatpush3.bf16.msra.mxu0 %v3420_v16  ;;  %3410 = vmatprep.subr.bf16.mxu1 %v4481_v11  ;;  %v3196_v35 = vld [vmem:[%s1048_s2] ss:$0 sm:$0xff]  ;;  %v3414_v37 = vpack.c.bf16 %v1443_v33, %v1442_v32  ;;  %v3417_v41 = vpack.c.bf16 %v1445_v40, %v1444_v39  ;;  %v1610_v63 = vsub.s32 0, %v1609_v62  ;;  %v2299_v62 = vld [vmem:[%s5450_s26] sm:$0xff]  ;;  %s4487_s2 = smov 8   ;;  %s5980_s25 = scalar_lea.vmem [#allocation21], %s5412_s8 }
 0x2ce   : > { %3422 = vmatprep.subr.bf16.mxu0 %v4481_v11  ;;  %v3197_v42 = vld [vmem:[%s1065_s9] ss:$0 sm:$0xff]  ;;  %s4489_s9 = smov 24   ;;  %s5982_s19 = scalar_lea.vmem [#allocation24], %s5412_s8  ;;  %vm2521_vm12 = vcmask 523264  }
 0x2cf   : > { %v3199_v48 = vld [vmem:[%s1082_s16] ss:$0 sm:$0xff]  ;;  %s5981_s16 = scalar_lea.vmem [#allocation23], %s5412_s8 }
 0x2d0   : > { %3412 = vmatpush3.bf16.msra.mxu1 %v3411_v20  ;;  %v3201_v52 = vld [vmem:[%s1099_s14] ss:$0 sm:$0xff]  ;;  %s5983_s14 = sld [smem:[#allocation59_spill]] }
 0x2d1   : > { %3424 = vmatpush3.bf16.msra.mxu0 %v3423_v21  ;;  %3413 = vmatprep.subr.bf16.mxu1 %v4481_v11  ;;  %v1604_v61 = vld [vmem:[%s5979_s1] sm:$0x1] }
 0x2d2   : > { %3336 = vmatprep.subr.mxu0 %v4483_v19  ;;  %vm1605_vm6 = vcmp.eq.f32.partialorder %v1604_v61, 0.0 }
 0x2d3   : > { %v1606_v0 = vsel %vm1605_vm6, -1e+09, %v4483_v19 }
 0x2d4   : > { %v1611_v2 = vrot.slane %v1606_v0, %v1610_v63  ;;  %v2300_v63 = vld [vmem:[%s5450_s26 + $0x8] sm:$0xff]  ;;  %v2301_v0 = vld [vmem:[%s5450_s26 + $0x10] sm:$0xff] }
 0x2d6   : > { %p3226_p10 = scmp.ne.s32.totalorder %s5983_s14, 1 }
 0x357   : > { %v1325_v3 = vpop.xlane.xlu0 %1324 }
 0x358   : > { %v1327_v4 = vmul.f32 0.03125, %v1325_v3 }
 0x35a   : > { %v1328_v5 = vsub.f32 %v5501_v1, %v1327_v4 }
 0x35c   : > { %v1329_v6 = vmul.f32 %v1328_v5, %v1328_v5  ;;  %v1340_v31 = vmul.f32 %v3195_v30, %v1328_v5 }
 0x35e   : > { %v1330_v7 = vsel %vm1322_vm1, %v1329_v6, 0.0 }
 0x35f   : > { %1331 = vadd.xlane.f32.xlu0 %v1330_v7 }
 0x3ec   : > { %v1332_v22 = vpop.xlane.xlu0 %1331 }
 0x3ed   : > { %v1333_v23 = vmul.f32 0.032258064, %v1332_v22 }
 0x3ef   : > { %3643 = vrsqrt.f32 %v1333_v23  ;;  %vm1343_vm3 = vcmp.eq.f32.partialorder %v1333_v23, inf  ;;  %v1346_v26 = vand.u32 2147483648, %v1333_v23  ;;  %vm1345_vm4 = vcmp.eq.f32.partialorder %v1333_v23, 0.0 }
 0x3f9   : > { %v3644_v24 = vpop.eup %3643 }
 0x3fa   : > { %v1342_v25 = vmul.f32 %v3644_v24, %v1333_v23 }
 0x3fc   : > { %v1344_v27 = vsel %vm1343_vm3, %v1333_v23, %v1342_v25 }
 0x3fd   : > { %v1347_v28 = vsel %vm1345_vm4, %v1346_v26, %v1344_v27 }
 0x3fe   : > { %v1348_v29 = vadd.f32 1e-06, %v1347_v28 }
 0x400   : > { %3645 = vrcp.f32 %v1348_v29 }
 0x40a   : > { %v3646_v34 = vpop.eup %3645 }
 0x40b   : > { %v1350_v36 = vmul.f32 %v3646_v34, %v1340_v31 }
 0x40d   : > { %v1357_v38 = vadd.f32 %v3196_v35, %v1350_v36 }
 0x40f   : > { %3302 = vmatmul.mubr.msk.f32.vlgmr.msra.gmra.mrb[0].mxu1 %vm1322_vm1, %v1357_v38  ;;  %3324 = vmatmul.mubr.msk.f32.vlgmr.msra.gmra.mrb[0].mxu0 %vm1322_vm1, %v1357_v38 }
 0x410   : > { %3415 = vmatpush3.bf16.msra.mxu1 %v3414_v37  ;;  %3312 = vmatprep.mubr.msk.f32.mxu1 %vm4482_vm2, %v4483_v19 }
 0x411   : > { %3416 = vmatprep.subr.bf16.mxu1 %v4481_v11  ;;  %3338 = vmatprep.mubr.msk.f32.mxu0 %vm4482_vm2, %v4483_v19 }
 0x414   : > { %3418 = vmatpush3.bf16.msra.mxu1 %v3417_v41 }
 0x415   : > { %3326 = vmatprep.subr.mxu1 %v4483_v19 }
 0x417   : > { %3313 = vmatmul.mubr.msk.f32.vlgmr.msra.gmra.mrb[2].mxu1 %vm1322_vm1, %v1357_v38 }
 0x418   : > { %3328 = vmatprep.mubr.msk.f32.mxu1 %vm4482_vm2, %v4483_v19 }
 0x4e2   : > { %v1438_v43 = vpop.f32.mrb[0].mxu1  ;;  %v1600_v44 = vpop.f32.mrb[0].mxu0 }
 0x4e3   : > { %v1439_v45 = vadd.f32 %v3197_v42, %v1438_v43  ;;  %v3303_v46 = vpop.f32.mrb[1].mxu1  ;;  %v3325_v47 = vpop.f32.mrb[1].mxu0  ;;  %v5555_v53 = vadd.f32 %v3201_v52, %v1600_v44 }
 0x4e5   : > { %1777 = vrot.lane.b32.xlu1 %v1439_v45, %s4484_s24 }
 0x4ea   : > { %v1519_v49 = vpop.f32.mrb[2].mxu1 }
 0x4eb   : > { %v1520_v50 = vadd.f32 %v3199_v48, %v1519_v49  ;;  %v3314_v51 = vpop.f32.mrb[3].mxu1 }
 0x4ed   : > { %1948 = vrot.lane.b32.xlu0 %v1520_v50, %s4485_s30  ;;  %1779 = vrot.lane.b32.xlu1 %v1520_v50, %s4484_s24 }
 0x4ee   : > { %3327 = vmatpush3.xpose.msk.msra.mxu1 %vm1613_vm5, %v1520_v50 }
 0x4ef   : > { %3331 = vmatprep.subr.mxu1 %v4483_v19 }
 0x4f1   : > { %3329 = vmatmul.mubr.msk.f32.vlgmr.msra.gmra.mrb[4].mxu1 %vm1613_vm5, %v1439_v45  ;;  %1946 = vrot.lane.b32.xlu1 %v1439_v45, %s4485_s30 }
 0x4f2   : > { %3332 = vmatpush3.msra.mxu1 %v5555_v53  ;;  %3333 = vmatprep.mubr.msk.f32.mxu1 %vm4482_vm2, %v4483_v19 }
 0x4f3   : > { %3341 = vmatprep.subr.mxu1 %v4483_v19 }
 0x4f5   : > { %2116 = vrot.lane.b32.xlu1 %v1520_v50, %s4486_s29 }
 0x4f9   : > { %2114 = vrot.lane.b32.xlu1 %v1439_v45, %s4486_s29 }
 0x557   : > { %v1778_v54 = vpop.permute.xlu1 %1777 }
 0x55f   : > { %v1780_v55 = vpop.permute.xlu1 %1779  ;;  %v1949_v56 = vpop.permute.xlu0 %1948 }
 0x560   : > { %3337 = vmatpush3.xpose.msk.msra.mxu0 %vm1613_vm5, %v1780_v55 }
 0x561   : > { %3346 = vmatprep.subr.mxu0 %v4483_v19 }
 0x563   : > { %3339 = vmatmul.mubr.msk.f32.vlgmr.msra.gmra.mrb[2].mxu0 %vm1613_vm5, %v1778_v54  ;;  %v1947_v57 = vpop.permute.xlu1 %1946 }
 0x564   : > { %3347 = vmatpush3.xpose.msk.msra.mxu0 %vm1613_vm5, %v1949_v56  ;;  %3348 = vmatprep.mubr.msk.f32.mxu0 %vm4482_vm2, %v4483_v19 }
 0x565   : > { %3356 = vmatprep.subr.mxu0 %v4483_v19 }
 0x567   : > { %3349 = vmatmul.mubr.msk.f32.vlgmr.msra.gmra.mrb[4].mxu0 %vm1613_vm5, %v1947_v57  ;;  %v2117_v58 = vpop.permute.xlu1 %2116 }
 0x568   : > { %3357 = vmatpush3.xpose.msk.msra.mxu0 %vm1613_vm5, %v2117_v58  ;;  %3358 = vmatprep.mubr.msk.f32.mxu0 %vm4482_vm2, %v4483_v19 }
 0x569   : > { %3425 = vmatprep.subr.bf16.mxu0 %v4481_v11 }
 0x56b   : > { %v2115_v59 = vpop.permute.xlu1 %2114 }
 0x56c   : > { %3359 = vmatmul.mubr.msk.f32.vlgmr.msra.gmra.mrb[6].mxu0 %vm1613_vm5, %v2115_v59 }
 0x56d   : > { %3374 = vmatprep.mubr.msk.f32.mxu0 %vm4482_vm2, %v4483_v19 }
 0x5c4   : > { %v1686_v3 = vpop.f32.mrb[4].mxu1 }
 0x5c5   : > { %v1687_v4 = vadd.f32 %v1686_v3, %v1611_v2  ;;  %v3330_v5 = vpop.f32.mrb[5].mxu1  ;;  %v2302_v3 = vld [vmem:[%s5450_s26 + $0x18] sm:$0xff] }
 0x5c7   : > { %v1690_v6 = vsel %vm1613_vm5, %v1687_v4, -inf }
 0x5c8   : > { %1691 = vmax.xlane.f32.xlu1 %v1690_v6 }
 0x636   : > { %v1851_v7 = vpop.f32.mrb[2].mxu0 }
 0x637   : > { %v1852_v8 = vadd.f32 %v1851_v7, %v1611_v2  ;;  %v3340_v9 = vpop.f32.mrb[3].mxu0 }
 0x639   : > { %v1855_v10 = vsel %vm1613_vm5, %v1852_v8, -inf }
 0x63a   : > { %1856 = vmax.xlane.f32.xlu0 %v1855_v10  ;;  %v2020_v12 = vpop.f32.mrb[4].mxu0 }
 0x63b   : > { %v2021_v13 = vadd.f32 %v2020_v12, %v1611_v2  ;;  %v3350_v14 = vpop.f32.mrb[5].mxu0 }
 0x63d   : > { %v2024_v15 = vsel %vm1613_vm5, %v2021_v13, -inf }
 0x63e   : > { %2025 = vmax.xlane.f32.xlu1 %v2024_v15 }
 0x63f   : > { %v2188_v16 = vpop.f32.mrb[6].mxu0 }
 0x640   : > { %v2189_v17 = vadd.f32 %v2188_v16, %v1611_v2  ;;  %v3360_v18 = vpop.f32.mrb[7].mxu0  ;;  %v3426_v2 = vpack.c.bf16 %v2300_v63, %v2299_v62 }
 0x641   : > { %v3218_v18 = vld [vmem:[%s5980_s25] ss:$0 sm:$0xff] }
 0x642   : > { %v2192_v20 = vsel %vm1613_vm5, %v2189_v17, -inf  ;;  %3427 = vmatpush3.bf16.msra.mxu0 %v3426_v2 }
 0x643   : > { %2193 = vmax.xlane.f32.xlu1 %v2192_v20  ;;  %3428 = vmatprep.subr.bf16.mxu0 %v4481_v11 }
 0x655   : > { %v1692_v21 = vpop.xlane.xlu1 %1691 }
 0x656   : > { %v1693_v22 = vsub.f32 %v1687_v4, %v1692_v21  ;;  %v3429_v4 = vpack.c.bf16 %v2302_v3, %v2301_v0  ;;  %v3224_v0 = vld [vmem:[%s1166_s7] ss:$0 sm:$0xff] }
 0x658   : > { %v1694_v23 = vmul.f32 1.442695, %v1693_v22  ;;  %3430 = vmatpush3.bf16.msra.mxu0 %v3429_v4 }
 0x659   : > { %3437 = vmatprep.subr.bf16.mxu0 %v4481_v11 }
 0x65a   : > { %3647 = vpow2.f32 %v1694_v23 }
 0x664   : > { %v3648_v24 = vpop.eup %3647 }
 0x665   : > { %v1696_v25 = vsel %vm1613_vm5, %v3648_v24, 0.0 }
 0x666   : > { %1697 = vadd.xlane.f32.xlu0 %v1696_v25 }
 0x6c7   : > { %v1857_v26 = vpop.xlane.xlu0 %1856 }
 0x6c8   : > { %v1858_v27 = vsub.f32 %v1852_v8, %v1857_v26 }
 0x6ca   : > { %v1859_v28 = vmul.f32 1.442695, %v1858_v27 }
 0x6cb   : > { %v2026_v29 = vpop.xlane.xlu1 %2025 }
 0x6cc   : > { %3649 = vpow2.f32 %v1859_v28  ;;  %v2027_v30 = vsub.f32 %v2021_v13, %v2026_v29  ;;  %v2422_v29 = vld [vmem:[%s5465_s23 + $0x8] sm:$0xff] }
 0x6ce   : > { %v2028_v31 = vmul.f32 1.442695, %v2027_v30  ;;  %v2423_v30 = vld [vmem:[%s5465_s23 + $0x10] sm:$0xff] }
 0x6d0   : > { %3651 = vpow2.f32 %v2028_v31  ;;  %v2194_v37 = vpop.xlane.xlu1 %2193 }
 0x6d1   : > { %v2195_v38 = vsub.f32 %v2189_v17, %v2194_v37 }
 0x6d3   : > { %v2196_v39 = vmul.f32 1.442695, %v2195_v38  ;;  %v2509_v38 = vld [vmem:[%s5474_s4 + $0x18] sm:$0xff] }
 0x6d6   : > { %v3650_v32 = vpop.eup %3649 }
 0x6d7   : > { %v1861_v33 = vsel %vm1613_vm5, %v3650_v32, 0.0 }
 0x6d8   : > { %1862 = vadd.xlane.f32.xlu1 %v1861_v33 }
 0x6da   : > { %v3652_v34 = vpop.eup %3651 }
 0x6db   : > { %v2030_v35 = vsel %vm1613_vm5, %v3652_v34, 0.0 }
 0x6dc   : > { %2031 = vadd.xlane.f32.xlu0 %v2030_v35  ;;  %v2507_v35 = vld [vmem:[%s5474_s4 + $0x8] sm:$0xff] }
 0x6e9   : > { %2038 = vrot.lane.b32.xlu1 %v5555_v53, %s4485_s30 }
 0x6f2   : > { %1870 = vrot.lane.b32.xlu0 %v5555_v53, %s4484_s24 }
 0x6f3   : > { %v1698_v36 = vpop.xlane.xlu0 %1697 }
 0x6f4   : > { %3653 = vrcp.f32 %v1698_v36  ;;  %v2508_v36 = vld [vmem:[%s5474_s4 + $0x10] sm:$0xff] }
 0x6f5   : > { %3655 = vpow2.f32 %v2196_v39  ;;  %v3441_v39 = vpack.c.bf16 %v2509_v38, %v2508_v36 }
 0x6fe   : > { %v3654_v40 = vpop.eup %3653 }
 0x6ff   : > { %v1700_v41 = vmul.f32 %v3654_v40, %v3648_v24  ;;  %v3656_v43 = vpop.eup %3655  ;;  %v2510_v40 = vld [vmem:[%s5474_s4 + $0x20] sm:$0xff] }
 0x700   : > { %v2198_v44 = vsel %vm1613_vm5, %v3656_v43, 0.0 }
 0x701   : > { %v1701_v42 = vpack.c.bf16 %v1700_v41, %v1700_v41  ;;  %3334 = vmatmul.mubr.msk.f32.vlgmr.msra.gmra.mrb[6].mxu1 %vm1613_vm5, %v1700_v41  ;;  %v2511_v41 = vld [vmem:[%s5474_s4 + $0x28] sm:$0xff] }
 0x702   : > { %3343 = vmatprep.mubr.msk.f32.mxu1 %vm4482_vm2, %v4483_v19 }
 0x703   : > { %1703 = vst.msk [vmem:[%s5497_s11] sm:$0xf] %vm1702_vm7, %v1701_v42  ;;  %v3444_v42 = vpack.c.bf16 %v2511_v41, %v2510_v40 }
 0x70d   : > { %2199 = vadd.xlane.f32.xlu1 %v2198_v44 }
 0x71e   : > { %2206 = vrot.lane.b32.xlu1 %v5555_v53, %s4486_s29 }
 0x765   : > { %v1863_v45 = vpop.xlane.xlu1 %1862 }
 0x766   : > { %3657 = vrcp.f32 %v1863_v45 }
 0x769   : > { %v2032_v46 = vpop.xlane.xlu0 %2031  ;;  %v2039_v51 = vpop.permute.xlu1 %2038 }
 0x76a   : > { %3659 = vrcp.f32 %v2032_v46 }
 0x76d   : > { %v1871_v47 = vpop.permute.xlu0 %1870 }
 0x76e   : > { %3342 = vmatpush3.msra.mxu1 %v1871_v47 }
 0x76f   : > { %3351 = vmatprep.subr.mxu1 %v4483_v19 }
 0x770   : > { %v3658_v48 = vpop.eup %3657 }
 0x771   : > { %v1865_v49 = vmul.f32 %v3658_v48, %v3650_v32  ;;  %v2424_v32 = vld [vmem:[%s5465_s23 + $0x18] sm:$0xff] }
 0x772   : > { %v3435_v33 = vpack.c.bf16 %v2424_v32, %v2423_v30 }
 0x773   : > { %v1866_v50 = vpack.c.bf16 %v1865_v49, %v1865_v49  ;;  %3344 = vmatmul.mubr.msk.f32.vlgmr.msra.gmra.mrb[8].mxu1 %vm1613_vm5, %v1865_v49 }
 0x774   : > { %v3660_v52 = vpop.eup %3659  ;;  %3352 = vmatpush3.msra.mxu1 %v2039_v51  ;;  %3353 = vmatprep.mubr.msk.f32.mxu1 %vm4482_vm2, %v4483_v19  ;;  %v3220_v51 = vld [vmem:[%s5981_s16] ss:$0 sm:$0xff] }
 0x775   : > { %3208 = vst.msk [vmem:[%s5497_s11 + $0x4] sm:$0xf] %vm1702_vm7, %v1866_v50  ;;  %v2034_v53 = vmul.f32 %v3660_v52, %v3652_v34  ;;  %3361 = vmatprep.subr.mxu1 %v4483_v19  ;;  %v2506_v34 = vld [vmem:[%s5474_s4] sm:$0xff] }
 0x776   : > { %v3438_v37 = vpack.c.bf16 %v2507_v35, %v2506_v34 }
 0x777   : > { %v2035_v54 = vpack.c.bf16 %v2034_v53, %v2034_v53  ;;  %3354 = vmatmul.mubr.msk.f32.vlgmr.msra.gmra.mrb[10].mxu1 %vm1613_vm5, %v2034_v53  ;;  %v3221_v53 = vld [vmem:[%s5982_s19] ss:$0 sm:$0xff] }
 0x778   : > { %3363 = vmatprep.mubr.msk.f32.mxu1 %vm4482_vm2, %v4483_v19 }
 0x779   : > { %3212 = vst.msk [vmem:[%s5497_s11 + $0x8] sm:$0xf] %vm1702_vm7, %v2035_v54 }
 0x79a   : > { %v2200_v55 = vpop.xlane.xlu1 %2199 }
 0x79b   : > { %3661 = vrcp.f32 %v2200_v55 }
 0x79e   : > { %v2207_v56 = vpop.permute.xlu1 %2206 }
 0x79f   : > { %3362 = vmatpush3.msra.mxu1 %v2207_v56  ;;  %v2512_v56 = vld [vmem:[%s5474_s4 + $0x30] sm:$0xff] }
 0x7a0   : > { %3431 = vmatprep.subr.bf16.mxu1 %v4481_v11 }
 0x7a5   : > { %v3662_v57 = vpop.eup %3661 }
 0x7a6   : > { %v2202_v58 = vmul.f32 %v3662_v57, %v3656_v43  ;;  %v2513_v57 = vld [vmem:[%s5474_s4 + $0x38] sm:$0xff] }
 0x7a8   : > { %v2203_v59 = vpack.c.bf16 %v2202_v58, %v2202_v58  ;;  %3364 = vmatmul.mubr.msk.f32.vlgmr.msra.gmra.mrb[12].mxu1 %vm1613_vm5, %v2202_v58  ;;  %v3447_v58 = vpack.c.bf16 %v2513_v57, %v2512_v56 }
 0x7a9   : > { %3385 = vmatprep.mubr.msk.f32.mxu1 %vm4482_vm2, %v4483_v19 }
 0x7aa   : > { %3216 = vst.msk [vmem:[%s5497_s11 + $0xc] sm:$0xf] %vm1702_vm7, %v2203_v59  ;;  %v3222_v59 = vld [vmem:[%s1149_s27] ss:$0 sm:$0xff] }
 0x7d4   : > { %v1773_v60 = vpop.f32.mrb[6].mxu1 }
 0x7d5   : > { %v3335_v61 = vpop.f32.mrb[7].mxu1 }
 0x846   : > { %v1942_v5 = vpop.f32.mrb[8].mxu1 }
 0x847   : > { %2283 = vrot.lane.b32.xlu0 %v1942_v5, %s4487_s2  ;;  %v3345_v6 = vpop.f32.mrb[9].mxu1 }
 0x84a   : > { %v2110_v7 = vpop.f32.mrb[10].mxu1 }
 0x84b   : > { %2287 = vrot.lane.b32.xlu1 %v2110_v7, %s4488_s13  ;;  %v3355_v8 = vpop.f32.mrb[11].mxu1 }
 0x87b   : > { %v2278_v9 = vpop.f32.mrb[12].mxu1 }
 0x87c   : > { %2291 = vrot.lane.b32.xlu0 %v2278_v9, %s4489_s9  ;;  %v3365_v10 = vpop.f32.mrb[13].mxu1 }
 0x8b9   : > { %v2284_v12 = vpop.permute.xlu0 %2283 }
 0x8ba   : > { %v2294_v14 = vsel %vm1613_vm5, %v1773_v60, %v2284_v12 }
 0x8bd   : > { %v2288_v13 = vpop.permute.xlu1 %2287 }
 0x8be   : > { %v2296_v15 = vsel %vm2295_vm8, %v2294_v14, %v2288_v13 }
 0x8ee   : > { %v2292_v16 = vpop.permute.xlu0 %2291 }
 0x8ef   : > { %v2298_v17 = vsel %vm2297_vm9, %v2296_v15, %v2292_v16 }
 0x8f0   : > { %3375 = vmatmul.mubr.msk.f32.vlgmr.msra.gmra.mrb[8].mxu0 %vm1322_vm1, %v2298_v17 }
 0x8f1   : > { %3404 = vmatprep.mubr.msk.f32.mxu0 %vm4482_vm2, %v4483_v19  ;;  %3439 = vmatpush3.bf16.msra.mxu0 %v3438_v37 }
 0x8f2   : > { %3440 = vmatprep.subr.bf16.mxu0 %v4481_v11 }
 0x8f5   : > { %3442 = vmatpush3.bf16.msra.mxu0 %v3441_v39 }
 0x8f6   : > { %3443 = vmatprep.subr.bf16.mxu0 %v4481_v11 }
 0x8f9   : > { %3445 = vmatpush3.bf16.msra.mxu0 %v3444_v42 }
 0x8fa   : > { %3446 = vmatprep.subr.bf16.mxu0 %v4481_v11 }
 0x8fd   : > { %3448 = vmatpush3.bf16.msra.mxu0 %v3447_v58 }
 0x9c3   : > { %v2379_v20 = vpop.f32.mrb[8].mxu0 }
 0x9c4   : > { %v2380_v21 = vadd.f32 %v3218_v18, %v2379_v20  ;;  %v3376_v22 = vpop.f32.mrb[9].mxu0 }
 0x9c6   : > { %v5633_v23 = vadd.f32 %v2380_v21, %v5501_v1  ;;  %v2421_v1 = vld [vmem:[%s5465_s23] sm:$0xff] }
 0x9c7   : > { %v3432_v31 = vpack.c.bf16 %v2422_v29, %v2421_v1 }
 0x9c8   : > { %2384 = vst.msk [vmem:[#allocation2] sm:$0xff] %vm1322_vm1, %v5633_v23  ;;  %v2387_v24 = vsel %vm1322_vm1, %v5633_v23, 0.0 }
 0x9c9   : > { %2388 = vadd.xlane.f32.xlu1 %v2387_v24  ;;  %3433 = vmatpush3.bf16.msra.mxu1 %v3432_v31 }
 0x9ca   : > { %3434 = vmatprep.subr.bf16.mxu1 %v4481_v11 }
 0x9cd   : > { %3436 = vmatpush3.bf16.msra.mxu1 %v3435_v33 }
 0xa56   : > { %v2389_v19 = vpop.xlane.xlu1 %2388 }
 0xa57   : > { %v2390_v25 = vmul.f32 0.03125, %v2389_v19 }
 0xa59   : > { %v2391_v26 = vsub.f32 %v5633_v23, %v2390_v25  ;;  %v3228_v25 = vld [vmem:[#allocation33] ss:$0 sm:$0xff] (!%p3226_p10) }
 0xa5b   : > { %v2392_v27 = vmul.f32 %v2391_v26, %v2391_v26  ;;  %v2403_v52 = vmul.f32 %v3220_v51, %v2391_v26 }
 0xa5d   : > { %v2393_v28 = vsel %vm1322_vm1, %v2392_v27, 0.0 }
 0xa5e   : > { %2394 = vadd.xlane.f32.xlu0 %v2393_v28 }
 0xaeb   : > { %v2395_v43 = vpop.xlane.xlu0 %2394 }
 0xaec   : > { %v2396_v44 = vmul.f32 0.032258064, %v2395_v43 }
 0xaee   : > { %3663 = vrsqrt.f32 %v2396_v44  ;;  %vm2406_vm10 = vcmp.eq.f32.partialorder %v2396_v44, inf  ;;  %v2409_v47 = vand.u32 2147483648, %v2396_v44  ;;  %vm2408_vm11 = vcmp.eq.f32.partialorder %v2396_v44, 0.0 }
 0xaf8   : > { %v3664_v45 = vpop.eup %3663 }
 0xaf9   : > { %v2405_v46 = vmul.f32 %v3664_v45, %v2396_v44 }
 0xafb   : > { %v2407_v48 = vsel %vm2406_vm10, %v2396_v44, %v2405_v46 }
 0xafc   : > { %v2410_v49 = vsel %vm2408_vm11, %v2409_v47, %v2407_v48 }
 0xafd   : > { %v2411_v50 = vadd.f32 1e-06, %v2410_v49 }
 0xaff   : > { %3665 = vrcp.f32 %v2411_v50 }
 0xb09   : > { %v3666_v11 = vpop.eup %3665 }
 0xb0a   : > { %v2413_v54 = vmul.f32 %v3666_v11, %v2403_v52 }
 0xb0c   : > { %v2420_v55 = vadd.f32 %v3221_v53, %v2413_v54 }
 0xb0e   : > { %3386 = vmatmul.mubr.msk.f32.vlgmr.msra.gmra.mrb[14].mxu1 %vm1322_vm1, %v2420_v55 }
 0xbe1   : > { %v2501_v60 = vpop.f32.mrb[14].mxu1 }
 0xbe2   : > { %v2502_v61 = vadd.f32 %v3222_v59, %v2501_v60  ;;  %v3387_v62 = vpop.f32.mrb[15].mxu1 }
 0xbe4   : > { %v2505_v63 = vmax.f32 %v2502_v61, 0.0 }
 0xbe6   : > { %3405 = vmatmul.mubr.msk.f32.vlgmr.msra.gmra.mrb[10].mxu0 %vm2521_vm12, %v2505_v63 }
 0xcb8   : > { %2600 = sbr.rel (%p3226_p10) target bundleno = 3597 (0xe0d), region = 188 }
 0xcb9   : > { %v2591_v2 = vpop.f32.mrb[10].mxu0 }
 0xcba   : > { %v2592_v3 = vadd.f32 %v3224_v0, %v2591_v2  ;;  %v3406_v4 = vpop.f32.mrb[11].mxu0 }
 0xcbc   : > { %v2595_v5 = vadd.f32 %v2592_v3, %v5633_v23  ;;  %v3227_v23 = vld [vmem:[#allocation32] ss:$0 sm:$0xff] (!%p3226_p10) }
 0xcbe   : > { %2596 = vst.msk [vmem:[#allocation2] sm:$0xff] %vm1322_vm1, %v2595_v5 }
 0xcc5   : > { %v2601_v6 = vld [vmem:[#allocation2] sm:$0xff] }
 0xcc6   : > { %v2604_v7 = vsel %vm1322_vm1, %v2601_v6, 0.0 }
 0xcc7   : > { %2605 = vadd.xlane.f32.xlu0 %v2604_v7 }
 0xd54   : > { %v2606_v8 = vpop.xlane.xlu0 %2605 }
 0xd55   : > { %v2607_v9 = vmul.f32 0.03125, %v2606_v8 }
 0xd57   : > { %v2608_v10 = vsub.f32 %v2601_v6, %v2607_v9 }
 0xd59   : > { %v2609_v12 = vmul.f32 %v2608_v10, %v2608_v10  ;;  %v2620_v24 = vmul.f32 %v3227_v23, %v2608_v10 }
 0xd5b   : > { %v2610_v13 = vsel %vm1322_vm1, %v2609_v12, 0.0 }
 0xd5c   : > { %2611 = vadd.xlane.f32.xlu0 %v2610_v13 }
 0xde9   : > { %v2612_v14 = vpop.xlane.xlu0 %2611 }
 0xdea   : > { %v2613_v15 = vmul.f32 0.032258064, %v2612_v14 }
 0xdec   : > { %3667 = vrsqrt.f32 %v2613_v15  ;;  %vm2623_vm13 = vcmp.eq.f32.partialorder %v2613_v15, inf  ;;  %v2626_v18 = vand.u32 2147483648, %v2613_v15  ;;  %vm2625_vm14 = vcmp.eq.f32.partialorder %v2613_v15, 0.0 }
 0xdf6   : > { %v3668_v16 = vpop.eup %3667 }
 0xdf7   : > { %v2622_v17 = vmul.f32 %v3668_v16, %v2613_v15 }
 0xdf9   : > { %v2624_v20 = vsel %vm2623_vm13, %v2613_v15, %v2622_v17 }
 0xdfa   : > { %v2627_v21 = vsel %vm2625_vm14, %v2626_v18, %v2624_v20 }
 0xdfb   : > { %v2628_v22 = vadd.f32 1e-06, %v2627_v21 }
 0xdfd   : > { %3669 = vrcp.f32 %v2628_v22 }
 0xe07   : > { %v3670_v19 = vpop.eup %3669 }
 0xe08   : > { %v2630_v26 = vmul.f32 %v3670_v19, %v2620_v24 }
 0xe0a   : > { %v2637_v27 = vadd.f32 %v3228_v25, %v2630_v26 }
 0xe0c   : > { %2638 = vst.msk [vmem:[%s5495_s5] sm:$0xff] %vm1322_vm1, %v2637_v27 }
 0xe0d PF: > { %s5984_s27 = sld [smem:[#allocation60_spill]]  ;;  %s5985_s8 = sld [smem:[#allocation69_spill]] }
 0xe0e   : > { %s5986_s23 = sld [smem:[#allocation94_spill]]  ;;  %s2658_s28 = sshll.u32 %s5495_s5, 4  ;;  %s2659_s28 = int_to_ptr.vmem [resolvable:$true] %s2658_s28 }
 0xe0f   : > { %s2640_s24 = scalar_lea.sflag [#allocation5], %s5390_s20  ;;  %s4231_s30 = scalar_lea.vmem %s2659_s28, 128 }
 0xe10   : > { %p4232_p0 = scmp.ne.s32.totalorder %s2659_s28, %s4231_s30  ;;  %s4490_s29 = smov [#allocation35]  }
 0xe11   : > { %s4235_s1 = sshll.u32 %s4490_s29, 4  ;;  %s4236_s1 = int_to_ptr.vmem [resolvable:$false] %s4235_s1 }
 0xe12   : > { %s4237_s2 = scalar_lea.vmem %s4236_s1, 256  ;;  %p4238_p5 = scmp.lt.s32.totalorder %s2659_s28, %s4236_s1 }
 0xe13   : > { %s3231_s26 = sshll.u32 %s5984_s27, 7  ;;  %p5988_p12 = scmp.ne.s32.totalorder %s5985_s8, 0 }
 0xe14   : > { %s5987_s12 = smov %s5986_s23  ;;  %s5677_s21 = scalar_lea.hbm %s5986_s23, %s3231_s26 }
 0xe15   : > { %p4233_p2 = pnand %p4232_p0, %p5988_p12  ;;  %p4239_p3 = scmp.lt.s32.totalorder %s4237_s2, %s4231_s30 }
 0xe17   : > { %p4234_p7 = pneg %p4233_p2  ;;  %p4240_p8 = por %p4239_p3, %p4238_p5 }
 0xe19   : > { %p4241_p13 = pnand %p4240_p8, %p4234_p7 }
 0xe1b   : > { %4244 = shalt.err (!%p4241_p13)
}
 0xe1c   : > { %s4245_s20 = scalar_lea.hbm %s5677_s21, 128  ;;  %s4249_s9 = scalar_lea.hbm %s5987_s12, 256 }
 0xe1d   : > { %p4246_p4 = scmp.ne.s32.totalorder %s5677_s21, %s4245_s20  ;;  %p4250_p6 = scmp.lt.u32.totalorder %s5677_s21, %s5987_s12 }
 0xe1e   : > { %p4251_p11 = scmp.lt.u32.totalorder %s4249_s9, %s4245_s20  ;;  %p4253_p0 = scmp.lt.u32.totalorder %s4245_s20, %s5677_s21 }
 0xe1f   : > { %p4247_p1 = pnand %p4246_p4, %p5988_p12 }
 0xe20   : > { %p4252_p10 = por %p4251_p11, %p4250_p6 }
 0xe21   : > { %p4248_p9 = pneg %p4247_p1 }
 0xe22   : > { %p4254_p2 = por %p4253_p0, %p4252_p10 }
 0xe24   : > { %p4255_p7 = pnand %p4254_p2, %p4248_p9 }
 0xe26   : > { %4258 = shalt.err (!%p4255_p7)
}
 0xe27   : > { %s5989_s19 = sld [smem:[#allocation59_spill]]  ;;  %s5991_s26 = sld [smem:[#allocation72_spill]] }
 0xe28   : > { %3493 = dma.vmem_to_hbm [thread:$0]  (%p5988_p12), %s2659_s28, 128, %s5677_s21, %s2640_s24  }
 0xe29   : > { %s3233_s4 = sshll.u32 %s5984_s27, 3  ;;  %s2673_s30 = sshll.u32 %s5497_s11, 4  ;;  %s5701_s30 = int_to_ptr.vmem [resolvable:$true] %s2673_s30 }
 0xe2a   : > { %s5992_s20 = sld [smem:[#allocation95_spill]]  ;;  %s5710_s5 = scalar_lea.sflag [#allocation37], %s1309_s6 }
 0xe2b   : > { %s4259_s13 = scalar_lea.vmem %s5701_s30, 256  ;;  %s4491_s11 = smov [#allocation36]  }
 0xe2c   : > { %p4260_p12 = scmp.ne.s32.totalorder %s5701_s30, %s4259_s13  ;;  %s4263_s27 = sshll.u32 %s4491_s11, 4  ;;  %s4264_s27 = int_to_ptr.vmem [resolvable:$false] %s4263_s27 }
 0xe2d   : > { %s3232_s7 = sshll.u32 %s5989_s19, 2  ;;  %p5993_p5 = scmp.ne.s32.totalorder %s5991_s26, 0 }
 0xe2e   : > { %s2670_s23 = sadd.s32 %s3233_s4, %s3232_s7  ;;  %s4265_s21 = scalar_lea.vmem %s4264_s27, 512 }
 0xe2f   : > { %s3234_s29 = sshll.u32 %s2670_s23, 6  ;;  %p4261_p3 = pnand %p4260_p12, %p5993_p5 }
 0xe30   : > { %s5706_s8 = scalar_lea.hbm %s5992_s20, %s3234_s29  ;;  %p4266_p13 = scmp.lt.s32.totalorder %s5701_s30, %s4264_s27 }
 0xe31   : > { %p4262_p8 = pneg %p4261_p3  ;;  %p4267_p4 = scmp.lt.s32.totalorder %s4265_s21, %s4259_s13 }
 0xe33   : > { %p4268_p1 = por %p4267_p4, %p4266_p13 }
 0xe35   : > { %p4269_p9 = pnand %p4268_p1, %p4262_p8 }
 0xe37   : > { %4272 = shalt.err (!%p4269_p9)
}
 0xe38   : > { %s4273_s6 = scalar_lea.hbm %s5706_s8, 256  ;;  %s4277_s9 = scalar_lea.hbm %s5992_s20, 1024 }
 0xe39   : > { %p4274_p6 = scmp.ne.s32.totalorder %s5706_s8, %s4273_s6  ;;  %p4278_p0 = scmp.lt.u32.totalorder %s5706_s8, %s5992_s20 }
 0xe3a   : > { %p4279_p2 = scmp.lt.u32.totalorder %s4277_s9, %s4273_s6  ;;  %p4281_p12 = scmp.lt.u32.totalorder %s4273_s6, %s5706_s8 }
 0xe3b   : > { %p4275_p11 = pnand %p4274_p6, %p5993_p5 }
 0xe3c   : > { %p4280_p7 = por %p4279_p2, %p4278_p0 }
 0xe3d   : > { %p4276_p10 = pneg %p4275_p11 }
 0xe3e   : > { %p4282_p3 = por %p4281_p12, %p4280_p7 }
 0xe40   : > { %p4283_p8 = pnand %p4282_p3, %p4276_p10 }
 0xe42   : > { %4286 = shalt.err (!%p4283_p8)
}
 0xe43   : > { %s4492_s19 = smov 64   ;;  %s4493_s14 = smov 4  }
 0xe44   : > { %3494 = dma.vmem_to_hbm [thread:$0]  (%p5993_p5), %s5701_s30, 256, %s5706_s8, %s5710_s5, %s4492_s19, %s4492_s19, %s4493_s14  }
 0xe45 PF: > { %s5994_s7 = sld [smem:[#allocation62_spill]]  ;;  %s5995_s4 = sld [smem:[#allocation57_spill]] }
 0xe46   : > { %s5996_s23 = sld [smem:[#allocation70_spill]] }
 0xe4b   : > { %p3515_p13 = scmp.ge.s32.totalorder %s5994_s7, 2  ;;  %s2688_s29 = sand.u32 1, %s5995_s4  }
 0xe4c   : > { %p5997_p4 = scmp.ne.s32.totalorder %s5996_s23, 0  ;;  %s2689_s1 = scalar_lea.sflag [#allocation5], %s2688_s29 }
 0xe4e   : > { %p3505_p1 = pnand %p3515_p13, %p5997_p4 }
 0xe50   : > { %4396 = dma.done.wait (!%p3505_p1), %s2689_s1, 128  }
 0xe51   : > { %4398 = vsyncadd (!%p3505_p1), %s2689_s1, 4294967168  ;;  %s5998_s2 = sld [smem:[#allocation53_spill]]  ;;  %s5999_s13 = sld [smem:[#allocation73_spill]] }
 0xe57   : > { %s2697_s11 = sand.u32 1, %s5998_s2   ;;  %p6000_p9 = scmp.ne.s32.totalorder %s5999_s13, 0 }
 0xe58   : > { %s2698_s27 = scalar_lea.sflag [#allocation37], %s2697_s11 }
 0xe59   : > { %p3508_p6 = pnand %p3515_p13, %p6000_p9 }
 0xe5b   : > { %4400 = dma.done.wait (!%p3508_p6), %s2698_s27, 256  }
 0xe5c   : > { %4402 = vsyncadd (!%p3508_p6), %s2698_s27, 4294967040  ;;  %s69_s1 = sadd.s32 1, %s5994_s7   ;;  %s6002_s2 = sld [smem:[#allocation54_spill]] }
 0xe5d   : > { %p5742_p5 = scmp.ge.s32.totalorder %s69_s1, 6   ;;  %s6003_s25 = sld [smem:[#allocation55_spill]] }
 0xe5e   : > { %s6004_s30 = sld [smem:[#allocation71_spill]]  ;;  %s6005_s8 = sld [smem:[#allocation56_spill]] }
 0xe5f   : > { %s6006_s28 = sld [smem:[#allocation66_spill]]  ;;  %s6007_s5 = sld [smem:[#allocation58_spill]] }
 0xe60   : > { %s6008_s4 = sld [smem:[#allocation67_spill]]  ;;  %s6009_s21 = sld [smem:[#allocation61_spill]] }
 0xe61   : > { %s6010_s6 = sld [smem:[#allocation63_spill]]  ;;  %s6011_s23 = sld [smem:[#allocation64_spill]] }
 0xe62   : > { %s6014_s27 = smov %s4421_s3  ;;  %s6016_s29 = smov %s4433_s0 }
 0xe63   :  { %68 = sbr.rel (!%p5742_p5) target bundleno = 54 (0x36), region = 386 }
 0xe64   : > { %s6013_s26 = smov %s6004_s30  ;;  %s6015_s3 = smov %s6005_s8 }
 0xe65   : > { %s6017_s0 = smov %s6007_s5  ;;  %s6018_s30 = smov %s4449_s22 }
 0xe66   : > { %s6019_s5 = smov %s6009_s21 }
 0xe67   : > { %s6020_s22 = smov %s6010_s6 }
 0xe6a   :  { %2703 = vsyncpa [#allocation4], 1 }
 0xe6b   :  { %2705 = vsyncpa [#allocation4 + $0x1], 1 }
 0xe6c   :  { %2706 = vsyncpa [#allocation7], 1 }
 0xe6d   :  { %2708 = vsyncpa [#allocation7 + $0x1], 1 }
 0xe6e   :  { %2709 = vsyncpa [#allocation10], 1 }
 0xe6f   :  { %2711 = vsyncpa [#allocation10 + $0x1], 1 }
 0xe70   :  { %2712 = vsyncpa [#allocation13], 1 }
 0xe71   :  { %2714 = vsyncpa [#allocation13 + $0x1], 1 }
 0xe72   :  { %2715 = vsyncpa [#allocation16], 1 }
 0xe73   :  { %2717 = vsyncpa [#allocation16 + $0x1], 1 }
 0xe74   :  { %2718 = vsyncpa [#allocation19], 1 }
 0xe75   :  { %2720 = vsyncpa [#allocation19 + $0x1], 1 }
 0xe76   :  { %2721 = vsyncpa [#allocation22], 1 }
 0xe77   :  { %2723 = vsyncpa [#allocation22 + $0x1], 1 }
 0xe78   :  { %2724 = vsyncpa [#allocation25], 1 }
 0xe79   :  { %2726 = vsyncpa [#allocation25 + $0x1], 1 }
 0xe7a   :  { %2727 = vsyncpa [#allocation28], 1 }
 0xe7b   :  { %2729 = vsyncpa [#allocation28 + $0x1], 1 }
 0xe7c   :  { %2730 = vsyncpa [#allocation31], 1 }
 0xe7d   :  { %2732 = vsyncpa [#allocation31 + $0x1], 1 }
 0xe7e   :  { %2733 = vsyncpa [#allocation34], 1 }
 0xe7f   :  { %2734 = vsyncpa [#allocation5], 1 }
 0xe80   :  { %2736 = vsyncpa [#allocation5 + $0x1], 1 }
 0xe81   :  { %2737 = vsyncpa [#allocation37], 1 }
 0xe82   :  { %2739 = vsyncpa [#allocation37 + $0x1], 1 }

</bundles_post_ra>
